<compile_context>
chip_gen: v5e
topology: v5e:2x2
jax: 0.10.0
libtpu: 0.0.40
codegen_flags: <defaults>
</compile_context>

<pallas_src>
import jax
import jax.numpy as jnp
from jax.experimental import pallas as pl
from jax.experimental.pallas import tpu as pltpu

F32 = jnp.float32
BF16 = jnp.bfloat16
BN_EPS = 1e-5

GROWTH = 32
BN_SIZE = 4
BLOCK_CFG = (6, 12, 24, 16)      # DenseNet121
NUM_INIT = 64
GROUP = 128                      # concat granularity for new features (4 * growth)

VMEM_LIMIT = 48 * 1024 * 1024    # fits v7x (64 MiB VMEM) and v5e/v6e (128 MiB)


# --------------------------- small helpers -----------------------------------

def _mosaic_params(grid_len):
    return pltpu.CompilerParams(
        dimension_semantics=("parallel",) * grid_len,
        vmem_limit_bytes=VMEM_LIMIT)


def _pick_tile(m, cap=512):
    """Largest M-tile <= cap that divides m (all dims here are multiples of 8)."""
    for t in (cap, 256, 128, 64, 32, 16, 8):
        if m % t == 0:
            return t
    return m


def _full_spec(shape):
    n = len(shape)
    return pl.BlockSpec(shape, lambda *_, n=n: (0,) * n)


def _split_rows(arr, widths):
    out, o = [], 0
    for w in widths:
        out.append(arr[o:o + w])
        o += w
    return out


# --------------------------- Pallas kernels -----------------------------------

def _make_mc_matmul_kernel(n_chunks, has_in_bn, has_out_aff, out_relu):
    """Multi-chunk fused kernel:
         acc = sum_c  [relu(bn_c(x_c)) if has_in_bn else x_c] @ W_c   (f32 acc)
         out = relu?(acc * out_scale + out_bias)                      (optional)
    """
    def kernel(*refs):
        i = 0
        x_refs = refs[i:i + n_chunks]; i += n_chunks
        if has_in_bn:
            s_refs = refs[i:i + n_chunks]; i += n_chunks
            b_refs = refs[i:i + n_chunks]; i += n_chunks
        w_refs = refs[i:i + n_chunks]; i += n_chunks
        if has_out_aff:
            os_ref = refs[i]; ob_ref = refs[i + 1]; i += 2
        o_ref = refs[i]

        acc = None
        for c in range(n_chunks):
            x = x_refs[c][...]
            if has_in_bn:
                x = jnp.maximum(x.astype(F32) * s_refs[c][...] + b_refs[c][...], 0.0)
            x = x.astype(BF16)
            part = jnp.dot(x, w_refs[c][...], preferred_element_type=F32)
            acc = part if acc is None else acc + part
        if has_out_aff:
            acc = acc * os_ref[...] + ob_ref[...]
        if out_relu:
            acc = jnp.maximum(acc, 0.0)
        o_ref[...] = acc.astype(o_ref.dtype)
    return kernel


def _bn_relu_avg4_kernel(a_ref, b_ref, c_ref, d_ref, s_ref, bb_ref, o_ref):
    # 2x2/stride-2 average pool of relu(x*scale+bias); the 4 inputs partition x.
    def t(r):
        return jnp.maximum(r[...].astype(F32) * s_ref[...] + bb_ref[...], 0.0)
    o_ref[...] = ((t(a_ref) + t(b_ref) + t(c_ref) + t(d_ref)) * 0.25).astype(o_ref.dtype)


def _max9_kernel(*refs):
    ins, o_ref = refs[:-1], refs[-1]
    m = ins[0][...]
    for r in ins[1:]:
        m = jnp.maximum(m, r[...])
    o_ref[...] = m


def _make_head_kernel(n_chunks):
    """norm5 BN + ReLU + global average pool + classifier matmul (+ bias), fused."""
    def kernel(*refs):
        i = 0
        x_refs = refs[i:i + n_chunks]; i += n_chunks
        s_refs = refs[i:i + n_chunks]; i += n_chunks
        b_refs = refs[i:i + n_chunks]; i += n_chunks
        w_refs = refs[i:i + n_chunks]; i += n_chunks
        cb_ref = refs[i]; i += 1
        o_ref = refs[i]

        acc = None
        for c in range(n_chunks):
            x = x_refs[c][...].astype(F32)                       # (N, H*W, Cc)
            y = jnp.maximum(x * s_refs[c][...] + b_refs[c][...], 0.0)
            pooled = jnp.mean(y, axis=1)                         # (N, Cc)
            part = jnp.dot(pooled.astype(BF16), w_refs[c][...],
                           preferred_element_type=F32)
            acc = part if acc is None else acc + part
        o_ref[...] = acc + cb_ref[...]
    return kernel


# --------------------------- kernel wrappers -----------------------------------

def multi_chunk_matmul(chunks, weights, *, in_scales=None, in_biases=None,
                       out_scale=None, out_bias=None, out_relu=False,
                       out_dtype=BF16):
    """sum_c relu?(bn_c(x_c)) @ W_c, with optional fused output affine+relu.

    chunks:  list of (M, C_c) arrays (bf16)
    weights: list of (C_c, N) arrays (bf16)
    """
    n = len(chunks)
    M = chunks[0].shape[0]
    Nout = weights[0].shape[1]
    has_in_bn = in_scales is not None
    has_out_aff = out_scale is not None

    tm = _pick_tile(M)
    grid = (M // tm,)

    args, in_specs = [], []
    for x in chunks:
        C = x.shape[1]
        args.append(x)
        in_specs.append(pl.BlockSpec((tm, C), lambda i: (i, 0)))
    if has_in_bn:
        for s in in_scales:
            C = s.shape[-1]
            args.append(s.reshape(1, C).astype(F32))
            in_specs.append(pl.BlockSpec((1, C), lambda i: (0, 0)))
        for b in in_biases:
            C = b.shape[-1]
            args.append(b.reshape(1, C).astype(F32))
            in_specs.append(pl.BlockSpec((1, C), lambda i: (0, 0)))
    for w in weights:
        args.append(w)
        in_specs.append(pl.BlockSpec(w.shape, lambda i: (0, 0)))
    if has_out_aff:
        args.append(out_scale.reshape(1, Nout).astype(F32))
        in_specs.append(pl.BlockSpec((1, Nout), lambda i: (0, 0)))
        args.append(out_bias.reshape(1, Nout).astype(F32))
        in_specs.append(pl.BlockSpec((1, Nout), lambda i: (0, 0)))

    kernel = _make_mc_matmul_kernel(n, has_in_bn, has_out_aff, out_relu)
    return pl.pallas_call(
        kernel,
        out_shape=jax.ShapeDtypeStruct((M, Nout), out_dtype),
        grid=grid,
        in_specs=in_specs,
        out_specs=pl.BlockSpec((tm, Nout), lambda i: (i, 0)),
        compiler_params=_mosaic_params(1),
    )(*args)


def pallas_bn_relu_avg4(slices2d, scale, bias):
    M, C = slices2d[0].shape
    tm = _pick_tile(M)
    specs = [pl.BlockSpec((tm, C), lambda i: (i, 0)) for _ in range(4)]
    specs += [pl.BlockSpec((1, C), lambda i: (0, 0))] * 2
    return pl.pallas_call(
        _bn_relu_avg4_kernel,
        out_shape=jax.ShapeDtypeStruct((M, C), BF16),
        grid=(M // tm,),
        in_specs=specs,
        out_specs=pl.BlockSpec((tm, C), lambda i: (i, 0)),
        compiler_params=_mosaic_params(1),
    )(*slices2d, scale.reshape(1, C).astype(F32), bias.reshape(1, C).astype(F32))


def pallas_max9(slices2d):
    M, C = slices2d[0].shape
    tm = _pick_tile(M)
    specs = [pl.BlockSpec((tm, C), lambda i: (i, 0)) for _ in slices2d]
    return pl.pallas_call(
        _max9_kernel,
        out_shape=jax.ShapeDtypeStruct((M, C), slices2d[0].dtype),
        grid=(M // tm,),
        in_specs=specs,
        out_specs=pl.BlockSpec((tm, C), lambda i: (i, 0)),
        compiler_params=_mosaic_params(1),
    )(*slices2d)


def pallas_final_head(chunks3d, scales, biases, w_chunks, cls_bias):
    """Fused norm5 BN+ReLU + global avg pool + classifier Linear (tiny shapes)."""
    n = len(chunks3d)
    Nb = chunks3d[0].shape[0]
    out_total = w_chunks[0].shape[1]

    args, specs = [], []
    for x in chunks3d:
        args.append(x); specs.append(_full_spec(x.shape))
    for s in scales:
        a = s.reshape(1, 1, -1).astype(F32)
        args.append(a); specs.append(_full_spec(a.shape))
    for b in biases:
        a = b.reshape(1, 1, -1).astype(F32)
        args.append(a); specs.append(_full_spec(a.shape))
    for w in w_chunks:
        args.append(w); specs.append(_full_spec(w.shape))
    cb = cls_bias.reshape(1, out_total).astype(F32)
    args.append(cb); specs.append(_full_spec(cb.shape))

    return pl.pallas_call(
        _make_head_kernel(n),
        out_shape=jax.ShapeDtypeStruct((Nb, out_total), F32),
        in_specs=specs,
        out_specs=_full_spec((Nb, out_total)),
    )(*args)


# --------------------------- layer helpers (glue + kernels) --------------------

def conv_im2col(x, w2d, kh, kw, stride, pad,
                out_scale=None, out_bias=None, out_relu=False):
    """NHWC conv via im2col + Pallas matmul.  w2d is (kh*kw*Cin [padded], Cout) bf16."""
    N, H, W, Cin = x.shape
    Cout = w2d.shape[1]
    Ho = (H + 2 * pad - kh) // stride + 1
    Wo = (W + 2 * pad - kw) // stride + 1
    xp = jnp.pad(x, ((0, 0), (pad, pad), (pad, pad), (0, 0))) if pad else x
    cols = [xp[:, ky:ky + Ho * stride:stride, kx:kx + Wo * stride:stride, :]
            for ky in range(kh) for kx in range(kw)]
    patches = jnp.concatenate(cols, axis=-1).reshape(N * Ho * Wo, kh * kw * Cin)
    Kw = w2d.shape[0]
    if Kw > patches.shape[1]:                      # K padded for lane alignment
        patches = jnp.pad(patches, ((0, 0), (0, Kw - patches.shape[1])))
    out = multi_chunk_matmul([patches], [w2d],
                             out_scale=out_scale, out_bias=out_bias,
                             out_relu=out_relu)
    return out.reshape(N, Ho, Wo, Cout)


def max_pool_3x3_s2_p1(x):
    N, H, W, C = x.shape
    Ho = (H + 2 - 3) // 2 + 1
    Wo = (W + 2 - 3) // 2 + 1
    xp = jnp.pad(x, ((0, 0), (1, 1), (1, 1), (0, 0)), constant_values=-jnp.inf)
    slices = [xp[:, ky:ky + 2 * Ho:2, kx:kx + 2 * Wo:2, :].reshape(N * Ho * Wo, C)
              for ky in range(3) for kx in range(3)]
    return pallas_max9(slices).reshape(N, Ho, Wo, C)


def dense_block(chunks, layer_params):
    """chunks: list of NHWC feature chunks (channel order = concat order)."""
    parts = []                                       # pending 32-wide new features
    for p in layer_params:
        eff = chunks + parts
        widths = [c.shape[-1] for c in eff]
        N, H, W, _ = eff[0].shape
        M = N * H * W
        x2d = [c.reshape(M, c.shape[-1]) for c in eff]
        s1 = _split_rows(p['bn1'][0], widths)
        b1 = _split_rows(p['bn1'][1], widths)
        w1 = _split_rows(p['conv1'], widths)
        # bn1 + relu + 1x1 conv (chunk-accumulated) + bn2 + relu, all in one kernel
        h = multi_chunk_matmul(x2d, w1, in_scales=s1, in_biases=b1,
                               out_scale=p['bn2'][0], out_bias=p['bn2'][1],
                               out_relu=True)
        h4 = h.reshape(N, H, W, -1)
        new = conv_im2col(h4, p['conv2'], 3, 3, 1, 1)            # (N,H,W,32)
        parts.append(new)
        if len(parts) * GROWTH == GROUP:             # fold 4 layers into one 128-wide chunk
            chunks = chunks + [jnp.concatenate(parts, axis=-1)]
            parts = []
    return chunks + parts


def transition(chunks, bn, w):
    """BN + ReLU + 2x2 avg-pool (fused, per chunk) then 1x1 conv (multi-chunk matmul).
    avg-pool is moved before the 1x1 conv (both linear -> commutes)."""
    scale, bias = bn
    widths = [c.shape[-1] for c in chunks]
    N, H, W, _ = chunks[0].shape
    Ho, Wo = H // 2, W // 2
    Mo = N * Ho * Wo
    s_chunks = _split_rows(scale, widths)
    b_chunks = _split_rows(bias, widths)
    w_chunks = _split_rows(w, widths)
    pooled = []
    for c, s, b in zip(chunks, s_chunks, b_chunks):
        Cc = c.shape[-1]
        slices = [c[:, dy::2, dx::2, :].reshape(Mo, Cc)
                  for dy in range(2) for dx in range(2)]
        pooled.append(pallas_bn_relu_avg4(slices, s, b))
    y = multi_chunk_matmul(pooled, w_chunks)                      # (Mo, C//2)
    return [y.reshape(N, Ho, Wo, -1)]


# --------------------------- parameters ----------------------------------------

def init_densenet121_params(key, out_size, mode):
    keys = iter(jax.random.split(key, 4096))

    def nk():
        return next(keys)

    def bn_params(c):
        gamma = 1.0 + 0.05 * jax.random.normal(nk(), (c,), F32)
        beta = 0.05 * jax.random.normal(nk(), (c,), F32)
        mean = 0.05 * jax.random.normal(nk(), (c,), F32)
        var = jax.random.uniform(nk(), (c,), F32, 0.8, 1.2)
        scale = gamma / jnp.sqrt(var + BN_EPS)
        bias = beta - mean * scale
        return scale, bias

    def conv_w2d(kh, kw, cin, cout, k_pad=None):
        std = (2.0 / (kh * kw * cin)) ** 0.5
        w = std * jax.random.normal(nk(), (kh * kw * cin, cout), F32)
        if k_pad is not None and k_pad > w.shape[0]:
            w = jnp.pad(w, ((0, k_pad - w.shape[0]), (0, 0)))
        return w.astype(BF16)

    params = {}
    params['conv0'] = conv_w2d(7, 7, 3, NUM_INIT, k_pad=256)   # K padded 147 -> 256
    params['norm0'] = bn_params(NUM_INIT)

    blocks, transitions = [], []
    c = NUM_INIT
    for bi, nl in enumerate(BLOCK_CFG):
        layers = []
        for _ in range(nl):
            layers.append({
                'bn1': bn_params(c),
                'conv1': conv_w2d(1, 1, c, BN_SIZE * GROWTH),
                'bn2': bn_params(BN_SIZE * GROWTH),
                'conv2': conv_w2d(3, 3, BN_SIZE * GROWTH, GROWTH),
            })
            c += GROWTH
        blocks.append(layers)
        if bi < len(BLOCK_CFG) - 1:
            transitions.append({'bn': bn_params(c),
                                'conv': conv_w2d(1, 1, c, c // 2)})
            c //= 2
    params['blocks'] = blocks
    params['transitions'] = transitions
    params['norm5'] = bn_params(c)                 # c == 1024 == num_ftrs
    num_ftrs = c

    def linear_params():
        std = (1.0 / num_ftrs) ** 0.5
        return {'w': (std * jax.random.normal(nk(), (num_ftrs, out_size), F32)).astype(BF16),
                'b': jnp.zeros((out_size,), F32)}  # nn.init.constant_(bias, 0)

    if mode in ('U-Ones', 'U-Zeros'):
        params['classifier'] = linear_params()
    else:   # 'U-MultiClass'
        params['Linear_0'] = linear_params()
        params['Linear_1'] = linear_params()
        params['Linear_u'] = linear_params()
    return params


# --------------------------- forward --------------------------------------------

def densenet121_forward(params, x_nchw, mode='U-Ones', drop_rate=0.0):
    assert mode in ('U-Ones', 'U-Zeros', 'U-MultiClass')
    x = jnp.transpose(x_nchw, (0, 2, 3, 1)).astype(BF16)          # NCHW -> NHWC, bf16

    # conv0 (7x7 s2 p3) fused with norm0 + relu0
    x = conv_im2col(x, params['conv0'], 7, 7, 2, 3,
                    out_scale=params['norm0'][0], out_bias=params['norm0'][1],
                    out_relu=True)
    x = max_pool_3x3_s2_p1(x)                                     # pool0

    chunks = [x]
    for bi, _ in enumerate(BLOCK_CFG):
        chunks = dense_block(chunks, params['blocks'][bi])
        if bi < len(BLOCK_CFG) - 1:
            t = params['transitions'][bi]
            chunks = transition(chunks, t['bn'], t['conv'])

    # norm5 + F.relu + adaptive_avg_pool2d + classifier, fused in a single kernel.
    widths = [c.shape[-1] for c in chunks]
    Nb, Hf, Wf, _ = chunks[0].shape
    chunks3d = [c.reshape(Nb, Hf * Wf, c.shape[-1]) for c in chunks]
    s5 = _split_rows(params['norm5'][0], widths)
    b5 = _split_rows(params['norm5'][1], widths)

    if mode in ('U-Ones', 'U-Zeros'):
        w_cls = params['classifier']['w']
        b_cls = params['classifier']['b']
    else:   # 'U-MultiClass': single lane-dense (1024, 3*out) matmul
        w_cls = jnp.concatenate([params[n]['w'] for n in ('Linear_0', 'Linear_1', 'Linear_u')],
                                axis=1)
        b_cls = jnp.concatenate([params[n]['b'] for n in ('Linear_0', 'Linear_1', 'Linear_u')])
    w_chunks = _split_rows(w_cls, widths)

    # drop_rate == 0 -> dropout is the identity (eval semantics)
    # TODO(synk): dropout for drop_rate > 0 would use pltpu.prng_* inside the head kernel.
    out = pallas_final_head(chunks3d, s5, b5, w_chunks, b_cls)    # (N, out_total) f32

    if mode == 'U-MultiClass':
        out = out.reshape(Nb, 3, -1)
    return out


# --------------------------- main -------------------------------------------------

if __name__ == "__main__":
    key = jax.random.PRNGKey(0)
    pkey, xkey = jax.random.split(key)

    OUT_SIZE = 6
    MODE = 'U-Ones'

    params = init_densenet121_params(pkey, OUT_SIZE, MODE)
    # PyTorch-style NCHW input (batch=2, 3 channels, 64x64 -> final 2x2 feature map)
    x = jax.random.normal(xkey, (2, 3, 64, 64), F32)

    out = densenet121_forward(params, x, mode=MODE)
    out = jax.block_until_ready(out)

    assert out.shape == (2, OUT_SIZE), out.shape
    assert bool(jnp.all(jnp.isfinite(out)))
    print("KERNEL_OK")
</pallas_src>

<mosaic_0001>
module attributes {stable_mosaic.version = 11 : i64} {
  func.func @kernel(%arg0: i32, %arg1: memref<512x256xbf16, #tpu.memory_space<vmem>>, %arg2: memref<256x64xbf16, #tpu.memory_space<vmem>>, %arg3: memref<1x64xf32, #tpu.memory_space<vmem>>, %arg4: memref<1x64xf32, #tpu.memory_space<vmem>>, %arg5: memref<512x64xbf16, #tpu.memory_space<vmem>>) attributes {dimension_semantics = [#tpu.dimension_semantics<parallel>], iteration_bounds = array<i64: 4>, scalar_prefetch = 0 : i64, scratch_operands = 0 : i64, tpu.core_type = #tpu.core_type<tc>, window_params = [{transform_indices = @transform_0, window_bounds = array<i64: 512, 256>}, {pipeline_mode = #tpu.pipeline_mode<synchronous>, transform_indices = @transform_1, window_bounds = array<i64: 256, 64>}, {pipeline_mode = #tpu.pipeline_mode<synchronous>, transform_indices = @transform_2, window_bounds = array<i64: 1, 64>}, {pipeline_mode = #tpu.pipeline_mode<synchronous>, transform_indices = @transform_3, window_bounds = array<i64: 1, 64>}, {transform_indices = @transform_4, window_bounds = array<i64: 512, 64>}]} {
    %c0 = arith.constant 0 : index
    %c0_0 = arith.constant 0 : index
    %0 = vector.load %arg1[%c0, %c0_0] : memref<512x256xbf16, #tpu.memory_space<vmem>>, vector<512x256xbf16>
    %c0_1 = arith.constant 0 : index
    %c0_2 = arith.constant 0 : index
    %1 = vector.load %arg2[%c0_1, %c0_2] : memref<256x64xbf16, #tpu.memory_space<vmem>>, vector<256x64xbf16>
    %cst = arith.constant dense<0.000000e+00> : vector<512x64xf32>
    %2 = tpu.matmul %0, %1, %cst {dimension_numbers = #tpu.dot_dimension_numbers<[1], [0], [0], [1], [0, 0, 1, 1], [], []>} : vector<512x256xbf16>, vector<256x64xbf16>, vector<512x64xf32> -> vector<512x64xf32>
    %c0_3 = arith.constant 0 : index
    %c0_4 = arith.constant 0 : index
    %3 = vector.load %arg3[%c0_3, %c0_4] : memref<1x64xf32, #tpu.memory_space<vmem>>, vector<1x64xf32>
    %4 = vector.broadcast %3 : vector<1x64xf32> to vector<512x64xf32>
    %5 = arith.mulf %2, %4 : vector<512x64xf32>
    %c0_5 = arith.constant 0 : index
    %c0_6 = arith.constant 0 : index
    %6 = vector.load %arg4[%c0_5, %c0_6] : memref<1x64xf32, #tpu.memory_space<vmem>>, vector<1x64xf32>
    %7 = vector.broadcast %6 : vector<1x64xf32> to vector<512x64xf32>
    %8 = arith.addf %5, %7 : vector<512x64xf32>
    %cst_7 = arith.constant 0.000000e+00 : f32
    %9 = vector.broadcast %cst_7 : f32 to vector<512x64xf32>
    %10 = arith.maximumf %8, %9 : vector<512x64xf32>
    %11 = arith.truncf %10 : vector<512x64xf32> to vector<512x64xbf16>
    %c0_8 = arith.constant 0 : index
    %c0_9 = arith.constant 0 : index
    %12 = vector.load %arg5[%c0_8, %c0_9] : memref<512x64xbf16, #tpu.memory_space<vmem>>, vector<512x64xbf16>
    tpu.vector_store %arg5[%c0_8, %c0_9], %11 {strides = array<i32>} : memref<512x64xbf16, #tpu.memory_space<vmem>>, vector<512x64xbf16>,
    return
  }
  func.func @transform_0(%arg0: i32) -> (i32, i32) {
    %c0_i32 = arith.constant 0 : i32
    %c0_i32_0 = arith.constant 0 : i32
    return %arg0, %c0_i32 : i32, i32
  }
  func.func @transform_1(%arg0: i32) -> (i32, i32) {
    %c0_i32 = arith.constant 0 : i32
    %c0_i32_0 = arith.constant 0 : i32
    %c0_i32_1 = arith.constant 0 : i32
    return %c0_i32, %c0_i32_0 : i32, i32
  }
  func.func @transform_2(%arg0: i32) -> (i32, i32) {
    %c0_i32 = arith.constant 0 : i32
    %c0_i32_0 = arith.constant 0 : i32
    %c0_i32_1 = arith.constant 0 : i32
    return %c0_i32, %c0_i32_0 : i32, i32
  }
  func.func @transform_3(%arg0: i32) -> (i32, i32) {
    %c0_i32 = arith.constant 0 : i32
    %c0_i32_0 = arith.constant 0 : i32
    %c0_i32_1 = arith.constant 0 : i32
    return %c0_i32, %c0_i32_0 : i32, i32
  }
  func.func @transform_4(%arg0: i32) -> (i32, i32) {
    %c0_i32 = arith.constant 0 : i32
    %c0_i32_0 = arith.constant 0 : i32
    return %arg0, %c0_i32 : i32, i32
  }
}

</mosaic_0001>

<bundles_post_ra>
// kernel: tpu_custom_call.1
= control target key start
LH: loop header
LB: loop body
LE: loop exit
PB: predicated region body
PF: predicated region fallthrough
CT: control target
= control target key end

     0   :  { %9 = vsyncpa [#allocation3], 0  ;;  %s2586_s0 = inlined_call_operand.hbm [shape: bf16[2048,256], index: 0, kind: input, shape index: {}]   ;;  %s2587_s1 = inlined_call_operand.vmem [shape: bf16[256,64], index: 1, kind: input, shape index: {}]   ;;  %s2588_s2 = inlined_call_operand.vmem [shape: f32[1,64], index: 2, kind: input, shape index: {}]   ;;  %s2589_s3 = inlined_call_operand.vmem [shape: f32[1,64], index: 3, kind: input, shape index: {}]   ;;  %s2590_s4 = inlined_call_operand.vmem [shape: bf16[2048,64], index: 4, kind: output, shape index: {}]  }
   0x1   :  { %11 = vsyncpa [#allocation3 + $0x1], 0  ;;  %s2039_s15 = smov 0   ;;  %s2041_s16 = smov 0  }
   0x2   :  { %s2043_s17 = smov 0   ;;  %s2045_s18 = smov 0  }
   0x3 LB: > { %s1469_s19 = sadd.s32 4294967295, %s2010_s18   ;;  %s2059_s20 = sadd.s32 1, %s2010_s18   ;;  %s2010_s18 = sphi %s2045_s18, %s2597_s18   ;;  %s2006_s17 = sphi %s2043_s17, %s2596_s17   ;;  %s2002_s16 = sphi %s2041_s16, %s2595_s16   ;;  %s1998_s15 = sphi %s2039_s15, %s2594_s15  }
   0x4   : > { %s21_s21 = ssub.s32 %s2010_s18, %s2059_s20  ;;  %s24_s22 = sadd.s32 1, %s2006_s17 }
   0x5   : > { %p22_p0 = scmp.eq.s32.totalorder %s21_s21, 0  ;;  %p31_p1 = scmp.ne.s32.totalorder %s2006_s17, %s2002_s16 }
   0x6   : > { %p32_p2 = scmp.eq.s32.totalorder %s2010_s18, 0  ;;  %p37_p3 = scmp.ne.s32.totalorder %s2002_s16, %s1998_s15 }
   0x7   : > { %s2069_s23 = scalar_select %p22_p0, %s2006_s17, %s24_s22  }
   0x8   : > { %p2071_p4 = por %p32_p2, %p31_p1  ;;  %p38_p5 = scmp.eq.s32.totalorder %s1469_s19, 0 }
   0x9   : > { %p1907_p6 = scmp.lt.s32.totalorder %s2010_s18, 4  ;;  %s159_s26 = sand.u32 1, %s2006_s17  }
   0xa   : > { %p2078_p7 = por %p38_p5, %p37_p3  ;;  %s1473_s27 = sshll.u32 %s159_s26, 9 }
   0xb   : > { %s1804_s28 = sshll.u32 %s2010_s18, 9  ;;  %s163_s6 = scalar_lea.vmem [#allocation2], %s1473_s27 }
   0xc   : > { %s169_s5 = scalar_lea.hbm %s2586_s0, %s1804_s28  ;;  %s172_s7 = sshll.u32 %s163_s6, 4  ;;  %s173_s7 = int_to_ptr.vmem [resolvable:$true] %s172_s7 }
   0xd   : > { %s170_s8 = sshll.u32 %s169_s5, 4  ;;  %p2089_p8 = pnand %p1907_p6, %p2071_p4  ;;  %s171_s8 = int_to_ptr.hbm [resolvable:$true] %s170_s8 }
   0xe   : > { %p1477_p9 = scmp.ge.s32.totalorder %s2010_s18, 1  ;;  %s160_s10 = scalar_lea.sflag [#allocation3], %s159_s26 }
   0xf   : > { %s1946_s11 = sshra.s32 %s171_s8, 4  ;;  %p1950_p11 = pneg %p2089_p8  ;;  %s1947_s11 = int_to_ptr.hbm [resolvable:$true] %s1946_s11 }
  0x10   : > { %s1948_s12 = scalar_lea.hbm %s1947_s11, 512  ;;  %s1953_s15 = scalar_lea.hbm %s2586_s0, 2048 }
  0x11   : > { %p1949_p10 = scmp.ne.s32.totalorder %s1947_s11, %s1948_s12  ;;  %p1954_p0 = scmp.lt.s32.totalorder %s1947_s11, %s2586_s0 }
  0x12   : > { %p1955_p1 = scmp.lt.s32.totalorder %s1953_s15, %s1948_s12 }
  0x13   : > { %p1951_p12 = pnand %p1950_p11, %p1949_p10 }
  0x14   : > { %p1956_p2 = por %p1955_p1, %p1954_p0 }
  0x15   : > { %p1952_p13 = pneg %p1951_p12 }
  0x17   : > { %p1957_p3 = pnand %p1956_p2, %p1952_p13 }
  0x19   : > { %1960 = shalt.err (!%p1957_p3)
}
  0x1a   : > { %s2012_s24 = smov 128   ;;  %s2013_s26 = smov 8  }
  0x1b   : > { %1906 = dma.hbm_to_vmem [thread:$0]  (!%p2089_p8), %s171_s8, 8192, %s173_s7, %s160_s10, %s2012_s24, %s2012_s24, %s2013_s26  }
  0x1c   : > { %p180_p4 = scmp.lt.s32.totalorder %s2010_s18, 5 }
  0x1e   : > { %p181_p5 = pnand %p1477_p9, %p180_p4 }
  0x1f   : > { %s186_s27 = sand.u32 (!%p181_p5), 1, %s2002_s16  }
  0x20   : > { %184 = sbr.rel (%p181_p5) target bundleno = 462 (0x1ce), region = 36  ;;  %s1478_s28 = sshll.u32 (!%p181_p5), %s186_s27, 9 }
  0x21   : > { %s187_s29 = scalar_lea.sflag (!%p181_p5), [#allocation3], %s186_s27  ;;  %s2108_s30 = scalar_lea.vmem (!%p181_p5), [#allocation2], %s1478_s28 }
  0x25   : > { %1993 = dma.done.wait (%p2078_p7), %s187_s29, 8192  }
  0x26   : > { %1995 = vsyncadd (%p2078_p7), %s187_s29, 4294959104  ;;  %v1876_v0 = vld [vmem:[%s2587_s1 + $0x38] sm:$0xff]  ;;  %v1875_v2 = vld [vmem:[%s2587_s1 + $0x30] sm:$0xff]  ;;  %s1479_s22 = sshll.u32 %s1469_s19, 6  ;;  %vm1337_vm0 = vcmask 519168  }
  0x27   : > { %v1884_v1 = vld [vmem:[%s2587_s1 + $0x78] sm:$0xff]  ;;  %735 = vmatpush.bf16.msra.mxu0 %v1876_v0  ;;  %1885 = vmatpush.bf16.msra.mxu2 %v1876_v0  ;;  %v1883_v3 = vld [vmem:[%s2587_s1 + $0x70] sm:$0xff]  ;;  %v1874_v4 = vld [vmem:[%s2587_s1 + $0x28] sm:$0xff]  ;;  %p218_p6 = scmp.lt.s32.totalorder %s1479_s22, 255 }
  0x28   : > { %904 = vmatpush.bf16.msra.mxu1 %v1884_v1  ;;  %1893 = vmatpush.bf16.msra.mxu3 %v1884_v1  ;;  %v1882_v5 = vld [vmem:[%s2587_s1 + $0x68] sm:$0xff]  ;;  %v1873_v6 = vld [vmem:[%s2587_s1 + $0x20] sm:$0xff]  ;;  %v1872_v8 = vld [vmem:[%s2587_s1 + $0x18] sm:$0xff] }
  0x29   : > { %v1881_v7 = vld [vmem:[%s2587_s1 + $0x60] sm:$0xff]  ;;  %v1880_v9 = vld [vmem:[%s2587_s1 + $0x58] sm:$0xff]  ;;  %v1871_v10 = vld [vmem:[%s2587_s1 + $0x10] sm:$0xff]  ;;  %s2599_s22 = smov (!%p218_p6, %s1479_s22), 255 }
  0x2a   : > { %v1879_v11 = vld [vmem:[%s2587_s1 + $0x50] sm:$0xff]  ;;  %v1870_v12 = vld [vmem:[%s2587_s1 + $0x8] sm:$0xff]  ;;  %v1869_v14 = vld [vmem:[%s2587_s1] sm:$0xff]  ;;  %s1480_s27 = sshll.u32 %s2599_s22, 2 }
  0x2b   : > { %736 = vmatpush.bf16.msra.mxu0 %v1875_v2  ;;  %1886 = vmatpush.bf16.msra.mxu2 %v1875_v2  ;;  %v1878_v13 = vld [vmem:[%s2587_s1 + $0x48] sm:$0xff]  ;;  %v1877_v15 = vld [vmem:[%s2587_s1 + $0x40] sm:$0xff]  ;;  %v1491_v28 = vld [vmem:[%s2108_s30 + $0x10] sm:$0xf]  ;;  %s2251_s5 = scalar_lea.vmem %s2590_s4, %s1480_s27 }
  0x2c   : > { %905 = vmatpush.bf16.msra.mxu1 %v1883_v3  ;;  %1894 = vmatpush.bf16.msra.mxu3 %v1883_v3  ;;  %v1483_v16 = vld [vmem:[%s2108_s30] sm:$0xf]  ;;  %v1806_v17 = vld [vmem:[%s2108_s30 + $0x4] sm:$0xf0]  ;;  %v1805_v20 = vld [vmem:[%s2108_s30 + $0x4] sm:$0xf] }
  0x2d   : > { %v1611_v18 = vld [vmem:[%s2108_s30 + $0x100] sm:$0xf]  ;;  %v1838_v19 = vld [vmem:[%s2108_s30 + $0x104] sm:$0xf0]  ;;  %v1485_v21 = vld [vmem:[%s2108_s30 + $0x8] sm:$0xf0]  ;;  %v1484_v24 = vor.u32 %v1806_v17, %v1483_v16 }
  0x2e   : > { %v1837_v22 = vld [vmem:[%s2108_s30 + $0x104] sm:$0xf]  ;;  %v1613_v23 = vld [vmem:[%s2108_s30 + $0x108] sm:$0xf0]  ;;  %v1612_v25 = vor.u32 %v1838_v19, %v1611_v18  ;;  %v1488_v26 = vor.u32 %v1805_v20, %v1485_v21  ;;  %v1808_v29 = vld [vmem:[%s2108_s30 + $0x14] sm:$0xf0] }
  0x2f   : > { %737 = vmatpush.bf16.msra.mxu0 %v1874_v4  ;;  %1887 = vmatpush.bf16.msra.mxu2 %v1874_v4  ;;  %v1616_v27 = vor.u32 %v1837_v22, %v1613_v23  ;;  %v1619_v30 = vld [vmem:[%s2108_s30 + $0x110] sm:$0xf]  ;;  %v1840_v31 = vld [vmem:[%s2108_s30 + $0x114] sm:$0xf0]  ;;  %v1807_v32 = vld [vmem:[%s2108_s30 + $0x14] sm:$0xf]  ;;  %v1492_v36 = vor.u32 %v1808_v29, %v1491_v28 }
  0x30   : > { %906 = vmatpush.bf16.msra.mxu1 %v1882_v5  ;;  %1895 = vmatpush.bf16.msra.mxu3 %v1882_v5  ;;  %v1493_v33 = vld [vmem:[%s2108_s30 + $0x18] sm:$0xf0]  ;;  %v1839_v34 = vld [vmem:[%s2108_s30 + $0x114] sm:$0xf]  ;;  %v1620_v37 = vor.u32 %v1840_v31, %v1619_v30  ;;  %v1499_v40 = vld [vmem:[%s2108_s30 + $0x20] sm:$0xf] }
  0x31   : > { %v1621_v35 = vld [vmem:[%s2108_s30 + $0x118] sm:$0xf0]  ;;  %v1496_v38 = vor.u32 %v1807_v32, %v1493_v33  ;;  %v1810_v41 = vld [vmem:[%s2108_s30 + $0x24] sm:$0xf0]  ;;  %v1627_v42 = vld [vmem:[%s2108_s30 + $0x120] sm:$0xf] }
  0x32   : > { %v1624_v39 = vor.u32 %v1839_v34, %v1621_v35  ;;  %v1842_v43 = vld [vmem:[%s2108_s30 + $0x124] sm:$0xf0]  ;;  %v1809_v44 = vld [vmem:[%s2108_s30 + $0x24] sm:$0xf]  ;;  %v1501_v45 = vld [vmem:[%s2108_s30 + $0x28] sm:$0xf0]  ;;  %v1500_v48 = vor.u32 %v1810_v41, %v1499_v40 }
  0x33   : > { %738 = vmatpush.bf16.msra.mxu0 %v1873_v6  ;;  %1888 = vmatpush.bf16.msra.mxu2 %v1873_v6  ;;  %v1841_v46 = vld [vmem:[%s2108_s30 + $0x124] sm:$0xf]  ;;  %v1629_v47 = vld [vmem:[%s2108_s30 + $0x128] sm:$0xf0]  ;;  %v1628_v49 = vor.u32 %v1842_v43, %v1627_v42  ;;  %v1504_v50 = vor.u32 %v1809_v44, %v1501_v45  ;;  %v1507_v52 = vld [vmem:[%s2108_s30 + $0x30] sm:$0xf] }
  0x34   : > { %907 = vmatpush.bf16.msra.mxu1 %v1881_v7  ;;  %1896 = vmatpush.bf16.msra.mxu3 %v1881_v7  ;;  %v1632_v51 = vor.u32 %v1841_v46, %v1629_v47  ;;  %v1812_v53 = vld [vmem:[%s2108_s30 + $0x34] sm:$0xf0]  ;;  %v1635_v54 = vld [vmem:[%s2108_s30 + $0x130] sm:$0xf]  ;;  %v1811_v56 = vld [vmem:[%s2108_s30 + $0x34] sm:$0xf] }
  0x35   : > { %v1844_v55 = vld [vmem:[%s2108_s30 + $0x134] sm:$0xf0]  ;;  %v1509_v57 = vld [vmem:[%s2108_s30 + $0x38] sm:$0xf0]  ;;  %v1843_v58 = vld [vmem:[%s2108_s30 + $0x134] sm:$0xf]  ;;  %v1508_v60 = vor.u32 %v1812_v53, %v1507_v52 }
  0x36   : > { %v1637_v59 = vld [vmem:[%s2108_s30 + $0x138] sm:$0xf0]  ;;  %v1636_v61 = vor.u32 %v1844_v55, %v1635_v54  ;;  %v1512_v62 = vor.u32 %v1811_v56, %v1509_v57  ;;  %v1515_v0 = vld [vmem:[%s2108_s30 + $0x40] sm:$0xf]  ;;  %v1814_v1 = vld [vmem:[%s2108_s30 + $0x44] sm:$0xf0] }
  0x37   : > { %739 = vmatpush.bf16.msra.mxu0 %v1872_v8  ;;  %1889 = vmatpush.bf16.msra.mxu2 %v1872_v8  ;;  %v1640_v63 = vor.u32 %v1843_v58, %v1637_v59  ;;  %v1643_v2 = vld [vmem:[%s2108_s30 + $0x140] sm:$0xf]  ;;  %v1846_v3 = vld [vmem:[%s2108_s30 + $0x144] sm:$0xf0]  ;;  %v1813_v4 = vld [vmem:[%s2108_s30 + $0x44] sm:$0xf]  ;;  %v1516_v8 = vor.u32 %v1814_v1, %v1515_v0 }
  0x38   : > { %908 = vmatpush.bf16.msra.mxu1 %v1880_v9  ;;  %1897 = vmatpush.bf16.msra.mxu3 %v1880_v9  ;;  %v1517_v5 = vld [vmem:[%s2108_s30 + $0x48] sm:$0xf0]  ;;  %v1845_v6 = vld [vmem:[%s2108_s30 + $0x144] sm:$0xf]  ;;  %v1644_v9 = vor.u32 %v1846_v3, %v1643_v2  ;;  %v1815_v16 = vld [vmem:[%s2108_s30 + $0x54] sm:$0xf] }
  0x39   : > { %v1645_v7 = vld [vmem:[%s2108_s30 + $0x148] sm:$0xf0]  ;;  %v1525_v17 = vld [vmem:[%s2108_s30 + $0x58] sm:$0xf0]  ;;  %v1847_v18 = vld [vmem:[%s2108_s30 + $0x154] sm:$0xf] }
  0x3a   : > { %v1653_v19 = vld [vmem:[%s2108_s30 + $0x158] sm:$0xf0]  ;;  %v1528_v22 = vor.u32 %v1815_v16, %v1525_v17  ;;  %v1817_v28 = vld [vmem:[%s2108_s30 + $0x64] sm:$0xf]  ;;  %v1533_v29 = vld [vmem:[%s2108_s30 + $0x68] sm:$0xf0] }
  0x3b   : > { %740 = vmatpush.bf16.msra.mxu0 %v1871_v10  ;;  %1890 = vmatpush.bf16.msra.mxu2 %v1871_v10  ;;  %v1520_v10 = vor.u32 %v1813_v4, %v1517_v5  ;;  %v1656_v23 = vor.u32 %v1847_v18, %v1653_v19  ;;  %v1849_v30 = vld [vmem:[%s2108_s30 + $0x164] sm:$0xf]  ;;  %v1661_v31 = vld [vmem:[%s2108_s30 + $0x168] sm:$0xf0]  ;;  %v1536_v34 = vor.u32 %v1817_v28, %v1533_v29  ;;  %v1819_v40 = vld [vmem:[%s2108_s30 + $0x74] sm:$0xf] }
  0x3c   : > { %909 = vmatpush.bf16.msra.mxu1 %v1879_v11  ;;  %1898 = vmatpush.bf16.msra.mxu3 %v1879_v11  ;;  %v1648_v11 = vor.u32 %v1845_v6, %v1645_v7  ;;  %v1664_v35 = vor.u32 %v1849_v30, %v1661_v31  ;;  %v1541_v41 = vld [vmem:[%s2108_s30 + $0x78] sm:$0xf0]  ;;  %v1851_v42 = vld [vmem:[%s2108_s30 + $0x174] sm:$0xf]  ;;  %v1821_v52 = vld [vmem:[%s2108_s30 + $0x84] sm:$0xf] }
  0x3d   : > { %v1669_v43 = vld [vmem:[%s2108_s30 + $0x178] sm:$0xf0]  ;;  %v1544_v46 = vor.u32 %v1819_v40, %v1541_v41  ;;  %v1549_v53 = vld [vmem:[%s2108_s30 + $0x88] sm:$0xf0]  ;;  %v1853_v54 = vld [vmem:[%s2108_s30 + $0x184] sm:$0xf] }
  0x3e   : > { %v1672_v47 = vor.u32 %v1851_v42, %v1669_v43  ;;  %v1677_v55 = vld [vmem:[%s2108_s30 + $0x188] sm:$0xf0]  ;;  %v2239_v59 = vld [vmem:[%s2588_s2] ss:$0 sm:$0xff]  ;;  %v1823_v18 = vld [vmem:[%s2108_s30 + $0x94] sm:$0xf] }
  0x3f   : > { %741 = vmatpush.bf16.msra.mxu0 %v1870_v12  ;;  %1891 = vmatpush.bf16.msra.mxu2 %v1870_v12  ;;  %v1523_v12 = vld [vmem:[%s2108_s30 + $0x50] sm:$0xf]  ;;  %v2244_v0 = vld [vmem:[%s2589_s3] ss:$0 sm:$0xff]  ;;  %v1557_v19 = vld [vmem:[%s2108_s30 + $0x98] sm:$0xf0] }
  0x40   : > { %910 = vmatpush.bf16.msra.mxu1 %v1878_v13  ;;  %1899 = vmatpush.bf16.msra.mxu3 %v1878_v13  ;;  %v1816_v13 = vld [vmem:[%s2108_s30 + $0x54] sm:$0xf0]  ;;  %v1560_v28 = vor.u32 %v1823_v18, %v1557_v19 }
  0x41   : > { %v1524_v20 = vor.u32 %v1816_v13, %v1523_v12  ;;  %v1555_v12 = vld [vmem:[%s2108_s30 + $0x90] sm:$0xf]  ;;  %v1824_v13 = vld [vmem:[%s2108_s30 + $0x94] sm:$0xf0] }
  0x43   : > { %742 = vmatpush.bf16.msra.mxu0 %v1869_v14  ;;  %1892 = vmatpush.bf16.msra.mxu2 %v1869_v14  ;;  %v1651_v14 = vld [vmem:[%s2108_s30 + $0x150] sm:$0xf] }
  0x44   : > { %911 = vmatpush.bf16.msra.mxu1 %v1877_v15  ;;  %1900 = vmatpush.bf16.msra.mxu3 %v1877_v15  ;;  %v1848_v15 = vld [vmem:[%s2108_s30 + $0x154] sm:$0xf0] }
  0x45   : > { %v1652_v21 = vor.u32 %v1848_v15, %v1651_v14  ;;  %v1683_v14 = vld [vmem:[%s2108_s30 + $0x190] sm:$0xf]  ;;  %v1856_v15 = vld [vmem:[%s2108_s30 + $0x194] sm:$0xf0] }
  0x46   : > { %743 = vmatmul.bf16.vlgmr.msra.gmra.mxu0 %v1484_v24  ;;  %823 = vmatmul.bf16.vlgmr.msra.gmra.mxu2 %v1612_v25  ;;  %v1531_v24 = vld [vmem:[%s2108_s30 + $0x60] sm:$0xf]  ;;  %v1818_v25 = vld [vmem:[%s2108_s30 + $0x64] sm:$0xf0] }
  0x47   : > { %912 = vmatmul.bf16.vlgmr.msra.gmra.mxu1 %v1488_v26  ;;  %992 = vmatmul.bf16.vlgmr.msra.gmra.mxu3 %v1616_v27  ;;  %v1659_v26 = vld [vmem:[%s2108_s30 + $0x160] sm:$0xf]  ;;  %v1850_v27 = vld [vmem:[%s2108_s30 + $0x164] sm:$0xf0]  ;;  %v1532_v32 = vor.u32 %v1818_v25, %v1531_v24 }
  0x48   : > { %v1660_v33 = vor.u32 %v1850_v27, %v1659_v26  ;;  %v1556_v26 = vor.u32 %v1824_v13, %v1555_v12  ;;  %v1684_v27 = vor.u32 %v1856_v15, %v1683_v14 }
  0x56   : > { %748 = vmatmul.bf16.gmra.mxu0 %v1492_v36  ;;  %828 = vmatmul.bf16.gmra.mxu2 %v1620_v37  ;;  %v1539_v36 = vld [vmem:[%s2108_s30 + $0x70] sm:$0xf]  ;;  %v1820_v37 = vld [vmem:[%s2108_s30 + $0x74] sm:$0xf0] }
  0x57   : > { %917 = vmatmul.bf16.gmra.mxu1 %v1496_v38  ;;  %997 = vmatmul.bf16.gmra.mxu3 %v1624_v39  ;;  %v1667_v38 = vld [vmem:[%s2108_s30 + $0x170] sm:$0xf]  ;;  %v1852_v39 = vld [vmem:[%s2108_s30 + $0x174] sm:$0xf0]  ;;  %v1540_v44 = vor.u32 %v1820_v37, %v1539_v36 }
  0x58   : > { %v1668_v45 = vor.u32 %v1852_v39, %v1667_v38 }
  0x66   : > { %753 = vmatmul.bf16.gmra.mxu0 %v1500_v48  ;;  %833 = vmatmul.bf16.gmra.mxu2 %v1628_v49  ;;  %v1547_v48 = vld [vmem:[%s2108_s30 + $0x80] sm:$0xf]  ;;  %v1822_v49 = vld [vmem:[%s2108_s30 + $0x84] sm:$0xf0] }
  0x67   : > { %922 = vmatmul.bf16.gmra.mxu1 %v1504_v50  ;;  %1002 = vmatmul.bf16.gmra.mxu3 %v1632_v51  ;;  %v1675_v50 = vld [vmem:[%s2108_s30 + $0x180] sm:$0xf]  ;;  %v1854_v51 = vld [vmem:[%s2108_s30 + $0x184] sm:$0xf0]  ;;  %v1548_v56 = vor.u32 %v1822_v49, %v1547_v48 }
  0x68   : > { %v1676_v57 = vor.u32 %v1854_v51, %v1675_v50 }
  0x76   : > { %758 = vmatmul.bf16.gmra.mxu0 %v1508_v60  ;;  %838 = vmatmul.bf16.gmra.mxu2 %v1636_v61  ;;  %v1552_v60 = vor.u32 %v1821_v52, %v1549_v53  ;;  %v1680_v61 = vor.u32 %v1853_v54, %v1677_v55  ;;  %v1563_v52 = vld [vmem:[%s2108_s30 + $0xa0] sm:$0xf]  ;;  %v1826_v53 = vld [vmem:[%s2108_s30 + $0xa4] sm:$0xf0] }
  0x77   : > { %927 = vmatmul.bf16.gmra.mxu1 %v1512_v62  ;;  %1007 = vmatmul.bf16.gmra.mxu3 %v1640_v63  ;;  %v1691_v54 = vld [vmem:[%s2108_s30 + $0x1a0] sm:$0xf]  ;;  %v1858_v55 = vld [vmem:[%s2108_s30 + $0x1a4] sm:$0xf0] }
  0x86   : > { %763 = vmatmul.bf16.gmra.mxu0 %v1516_v8  ;;  %843 = vmatmul.bf16.gmra.mxu2 %v1644_v9 }
  0x87   : > { %932 = vmatmul.bf16.gmra.mxu1 %v1520_v10  ;;  %1012 = vmatmul.bf16.gmra.mxu3 %v1648_v11 }
  0x96   : > { %768 = vmatmul.bf16.gmra.mxu0 %v1524_v20  ;;  %848 = vmatmul.bf16.gmra.mxu2 %v1652_v21  ;;  %v1855_v20 = vld [vmem:[%s2108_s30 + $0x194] sm:$0xf]  ;;  %v1685_v21 = vld [vmem:[%s2108_s30 + $0x198] sm:$0xf0] }
  0x97   : > { %937 = vmatmul.bf16.gmra.mxu1 %v1528_v22  ;;  %1017 = vmatmul.bf16.gmra.mxu3 %v1656_v23 }
  0xa6   : > { %773 = vmatmul.bf16.gmra.mxu0 %v1532_v32  ;;  %853 = vmatmul.bf16.gmra.mxu2 %v1660_v33  ;;  %v1688_v33 = vor.u32 %v1855_v20, %v1685_v21 }
  0xa7   : > { %942 = vmatmul.bf16.gmra.mxu1 %v1536_v34  ;;  %1022 = vmatmul.bf16.gmra.mxu3 %v1664_v35 }
  0xb6   : > { %778 = vmatmul.bf16.gmra.mxu0 %v1540_v44  ;;  %858 = vmatmul.bf16.gmra.mxu2 %v1668_v45 }
  0xb7   : > { %947 = vmatmul.bf16.gmra.mxu1 %v1544_v46  ;;  %1027 = vmatmul.bf16.gmra.mxu3 %v1672_v47 }
  0xc3   : > { %v744_v58 = vpop.f32.mrf.mxu0 }
  0xc4   : > { %v913_v62 = vpop.f32.mrf.mxu1 }
  0xc5   : > { %v914_v63 = vadd.f32 %v913_v62, %v744_v58  ;;  %v1825_v58 = vld [vmem:[%s2108_s30 + $0xa4] sm:$0xf]  ;;  %v1693_v62 = vld [vmem:[%s2108_s30 + $0x1a8] sm:$0xf0] }
  0xc6   : > { %783 = vmatmul.bf16.gmra.mxu0 %v1548_v56  ;;  %863 = vmatmul.bf16.gmra.mxu2 %v1676_v57 }
  0xc7   : > { %v1077_v1 = vmul.f32 %v2239_v59, %v914_v63  ;;  %952 = vmatmul.bf16.gmra.mxu1 %v1552_v60  ;;  %1032 = vmatmul.bf16.gmra.mxu3 %v1680_v61  ;;  %v1565_v60 = vld [vmem:[%s2108_s30 + $0xa8] sm:$0xf0]  ;;  %v1857_v61 = vld [vmem:[%s2108_s30 + $0x1a4] sm:$0xf] }
  0xc9   : > { %v1145_v2 = vadd.f32 %v2244_v0, %v1077_v1  ;;  %v824_v3 = vpop.f32.mrf.mxu2 }
  0xca   : > { %v993_v4 = vpop.f32.mrf.mxu3 }
  0xcb   : > { %v1209_v5 = vmax.f32 %v1145_v2, 0.0  ;;  %v994_v6 = vadd.f32 %v993_v4, %v824_v3  ;;  %v746_v7 = vpop.f32.mrf.mxu0  ;;  %v1564_v4 = vor.u32 %v1826_v53, %v1563_v52 }
  0xcc   : > { %v915_v8 = vpop.f32.mrf.mxu1 }
  0xcd   : > { %v1273_v9 = vpack.c.bf16 %v1209_v5, %v1209_v5  ;;  %v1109_v10 = vmul.f32 %v2239_v59, %v994_v6  ;;  %v916_v11 = vadd.f32 %v915_v8, %v746_v7  ;;  %v1692_v5 = vor.u32 %v1858_v55, %v1691_v54 }
  0xce   : > { %v1568_v6 = vor.u32 %v1825_v58, %v1565_v60 }
  0xcf   : > { %1338 = vst.msk [vmem:[%s2251_s5] sm:$0xf] %vm1337_vm0, %v1273_v9  ;;  %v1177_v16 = vadd.f32 %v2244_v0, %v1109_v10  ;;  %v1078_v17 = vmul.f32 %v2239_v59, %v916_v11  ;;  %v1696_v11 = vor.u32 %v1857_v61, %v1693_v62 }
  0xd1   : > { %v1241_v22 = vmax.f32 %v1177_v16, 0.0  ;;  %v1146_v23 = vadd.f32 %v2244_v0, %v1078_v17  ;;  %v826_v24 = vpop.f32.mrf.mxu2 }
  0xd2   : > { %v995_v25 = vpop.f32.mrf.mxu3 }
  0xd3   : > { %v1305_v29 = vpack.c.bf16 %v1241_v22, %v1241_v22  ;;  %v1210_v30 = vmax.f32 %v1146_v23, 0.0  ;;  %v996_v31 = vadd.f32 %v995_v25, %v826_v24  ;;  %v749_v32 = vpop.f32.mrf.mxu0 }
  0xd4   : > { %v918_v34 = vpop.f32.mrf.mxu1 }
  0xd5   : > { %1370 = vst.msk [vmem:[%s2251_s5 + $0x80] sm:$0xf] %vm1337_vm0, %v1305_v29  ;;  %v1274_v35 = vpack.c.bf16 %v1210_v30, %v1210_v30  ;;  %v1110_v36 = vmul.f32 %v2239_v59, %v996_v31  ;;  %v919_v37 = vadd.f32 %v918_v34, %v749_v32  ;;  %v1571_v30 = vld [vmem:[%s2108_s30 + $0xb0] sm:$0xf]  ;;  %v1828_v31 = vld [vmem:[%s2108_s30 + $0xb4] sm:$0xf0] }
  0xd6   : > { %788 = vmatmul.bf16.gmra.mxu0 %v1556_v26  ;;  %868 = vmatmul.bf16.gmra.mxu2 %v1684_v27  ;;  %v1699_v32 = vld [vmem:[%s2108_s30 + $0x1b0] sm:$0xf] }
  0xd7   : > { %1339 = vst.msk [vmem:[%s2251_s5 + $0x4] sm:$0xf] %vm1337_vm0, %v1274_v35  ;;  %v1178_v38 = vadd.f32 %v2244_v0, %v1110_v36  ;;  %v1079_v39 = vmul.f32 %v2239_v59, %v919_v37  ;;  %957 = vmatmul.bf16.gmra.mxu1 %v1560_v28  ;;  %1037 = vmatmul.bf16.gmra.mxu3 %v1688_v33  ;;  %v1860_v33 = vld [vmem:[%s2108_s30 + $0x1b4] sm:$0xf0]  ;;  %v1827_v36 = vld [vmem:[%s2108_s30 + $0xb4] sm:$0xf] }
  0xd8   : > { %v1573_v37 = vld [vmem:[%s2108_s30 + $0xb8] sm:$0xf0] }
  0xd9   : > { %v1242_v40 = vmax.f32 %v1178_v38, 0.0  ;;  %v1147_v41 = vadd.f32 %v2244_v0, %v1079_v39  ;;  %v829_v42 = vpop.f32.mrf.mxu2  ;;  %v1859_v38 = vld [vmem:[%s2108_s30 + $0x1b4] sm:$0xf]  ;;  %v1701_v39 = vld [vmem:[%s2108_s30 + $0x1b8] sm:$0xf0] }
  0xda   : > { %v998_v43 = vpop.f32.mrf.mxu3 }
  0xdb   : > { %v1306_v44 = vpack.c.bf16 %v1242_v40, %v1242_v40  ;;  %v1211_v45 = vmax.f32 %v1147_v41, 0.0  ;;  %v999_v46 = vadd.f32 %v998_v43, %v829_v42  ;;  %v751_v47 = vpop.f32.mrf.mxu0 }
  0xdc   : > { %v920_v48 = vpop.f32.mrf.mxu1 }
  0xdd   : > { %1371 = vst.msk [vmem:[%s2251_s5 + $0x84] sm:$0xf] %vm1337_vm0, %v1306_v44  ;;  %v1275_v49 = vpack.c.bf16 %v1211_v45, %v1211_v45  ;;  %v1111_v50 = vmul.f32 %v2239_v59, %v999_v46  ;;  %v921_v51 = vadd.f32 %v920_v48, %v751_v47  ;;  %v1572_v44 = vor.u32 %v1828_v31, %v1571_v30 }
  0xde   : > { %v1700_v45 = vor.u32 %v1860_v33, %v1699_v32  ;;  %v1576_v46 = vor.u32 %v1827_v36, %v1573_v37 }
  0xdf   : > { %1340 = vst.msk [vmem:[%s2251_s5 + $0x8] sm:$0xf] %vm1337_vm0, %v1275_v49  ;;  %v1179_v56 = vadd.f32 %v2244_v0, %v1111_v50  ;;  %v1080_v57 = vmul.f32 %v2239_v59, %v921_v51  ;;  %v1704_v51 = vor.u32 %v1859_v38, %v1701_v39 }
  0xe1   : > { %v1243_v63 = vmax.f32 %v1179_v56, 0.0  ;;  %v1148_v1 = vadd.f32 %v2244_v0, %v1080_v57  ;;  %v831_v2 = vpop.f32.mrf.mxu2 }
  0xe2   : > { %v1000_v3 = vpop.f32.mrf.mxu3 }
  0xe3   : > { %v1307_v7 = vpack.c.bf16 %v1243_v63, %v1243_v63  ;;  %v1212_v8 = vmax.f32 %v1148_v1, 0.0  ;;  %v1001_v9 = vadd.f32 %v1000_v3, %v831_v2  ;;  %v754_v10 = vpop.f32.mrf.mxu0 }
  0xe4   : > { %v923_v12 = vpop.f32.mrf.mxu1 }
  0xe5   : > { %1372 = vst.msk [vmem:[%s2251_s5 + $0x88] sm:$0xf] %vm1337_vm0, %v1307_v7  ;;  %v1276_v13 = vpack.c.bf16 %v1212_v8, %v1212_v8  ;;  %v1112_v14 = vmul.f32 %v2239_v59, %v1001_v9  ;;  %v924_v15 = vadd.f32 %v923_v12, %v754_v10  ;;  %v1579_v8 = vld [vmem:[%s2108_s30 + $0xc0] sm:$0xf]  ;;  %v1830_v9 = vld [vmem:[%s2108_s30 + $0xc4] sm:$0xf0] }
  0xe6   : > { %793 = vmatmul.bf16.gmra.mxu0 %v1564_v4  ;;  %873 = vmatmul.bf16.gmra.mxu2 %v1692_v5  ;;  %v1707_v10 = vld [vmem:[%s2108_s30 + $0x1c0] sm:$0xf] }
  0xe7   : > { %1341 = vst.msk [vmem:[%s2251_s5 + $0xc] sm:$0xf] %vm1337_vm0, %v1276_v13  ;;  %v1180_v16 = vadd.f32 %v2244_v0, %v1112_v14  ;;  %v1081_v17 = vmul.f32 %v2239_v59, %v924_v15  ;;  %962 = vmatmul.bf16.gmra.mxu1 %v1568_v6  ;;  %1042 = vmatmul.bf16.gmra.mxu3 %v1696_v11  ;;  %v1862_v11 = vld [vmem:[%s2108_s30 + $0x1c4] sm:$0xf0]  ;;  %v1829_v14 = vld [vmem:[%s2108_s30 + $0xc4] sm:$0xf] }
  0xe8   : > { %v1581_v15 = vld [vmem:[%s2108_s30 + $0xc8] sm:$0xf0] }
  0xe9   : > { %v1244_v18 = vmax.f32 %v1180_v16, 0.0  ;;  %v1149_v19 = vadd.f32 %v2244_v0, %v1081_v17  ;;  %v834_v20 = vpop.f32.mrf.mxu2  ;;  %v1861_v16 = vld [vmem:[%s2108_s30 + $0x1c4] sm:$0xf]  ;;  %v1709_v17 = vld [vmem:[%s2108_s30 + $0x1c8] sm:$0xf0] }
  0xea   : > { %v1003_v21 = vpop.f32.mrf.mxu3 }
  0xeb   : > { %v1308_v22 = vpack.c.bf16 %v1244_v18, %v1244_v18  ;;  %v1213_v23 = vmax.f32 %v1149_v19, 0.0  ;;  %v1004_v24 = vadd.f32 %v1003_v21, %v834_v20  ;;  %v756_v25 = vpop.f32.mrf.mxu0 }
  0xec   : > { %v925_v26 = vpop.f32.mrf.mxu1 }
  0xed   : > { %1373 = vst.msk [vmem:[%s2251_s5 + $0x8c] sm:$0xf] %vm1337_vm0, %v1308_v22  ;;  %v1277_v27 = vpack.c.bf16 %v1213_v23, %v1213_v23  ;;  %v1113_v28 = vmul.f32 %v2239_v59, %v1004_v24  ;;  %v926_v29 = vadd.f32 %v925_v26, %v756_v25  ;;  %v1580_v22 = vor.u32 %v1830_v9, %v1579_v8 }
  0xee   : > { %v1708_v23 = vor.u32 %v1862_v11, %v1707_v10  ;;  %v1584_v24 = vor.u32 %v1829_v14, %v1581_v15 }
  0xef   : > { %1342 = vst.msk [vmem:[%s2251_s5 + $0x10] sm:$0xf] %vm1337_vm0, %v1277_v27  ;;  %v1181_v34 = vadd.f32 %v2244_v0, %v1113_v28  ;;  %v1082_v35 = vmul.f32 %v2239_v59, %v926_v29  ;;  %v1712_v29 = vor.u32 %v1861_v16, %v1709_v17 }
  0xf1   : > { %v1245_v40 = vmax.f32 %v1181_v34, 0.0  ;;  %v1150_v41 = vadd.f32 %v2244_v0, %v1082_v35  ;;  %v836_v42 = vpop.f32.mrf.mxu2 }
  0xf2   : > { %v1005_v43 = vpop.f32.mrf.mxu3 }
  0xf3   : > { %v1309_v47 = vpack.c.bf16 %v1245_v40, %v1245_v40  ;;  %v1214_v48 = vmax.f32 %v1150_v41, 0.0  ;;  %v1006_v49 = vadd.f32 %v1005_v43, %v836_v42  ;;  %v759_v50 = vpop.f32.mrf.mxu0 }
  0xf4   : > { %v928_v52 = vpop.f32.mrf.mxu1 }
  0xf5   : > { %1374 = vst.msk [vmem:[%s2251_s5 + $0x90] sm:$0xf] %vm1337_vm0, %v1309_v47  ;;  %v1278_v53 = vpack.c.bf16 %v1214_v48, %v1214_v48  ;;  %v1114_v54 = vmul.f32 %v2239_v59, %v1006_v49  ;;  %v929_v55 = vadd.f32 %v928_v52, %v759_v50  ;;  %v1587_v48 = vld [vmem:[%s2108_s30 + $0xd0] sm:$0xf]  ;;  %v1832_v49 = vld [vmem:[%s2108_s30 + $0xd4] sm:$0xf0] }
  0xf6   : > { %798 = vmatmul.bf16.gmra.mxu0 %v1572_v44  ;;  %878 = vmatmul.bf16.gmra.mxu2 %v1700_v45  ;;  %v1715_v50 = vld [vmem:[%s2108_s30 + $0x1d0] sm:$0xf] }
  0xf7   : > { %1343 = vst.msk [vmem:[%s2251_s5 + $0x14] sm:$0xf] %vm1337_vm0, %v1278_v53  ;;  %v1182_v56 = vadd.f32 %v2244_v0, %v1114_v54  ;;  %v1083_v57 = vmul.f32 %v2239_v59, %v929_v55  ;;  %967 = vmatmul.bf16.gmra.mxu1 %v1576_v46  ;;  %1047 = vmatmul.bf16.gmra.mxu3 %v1704_v51  ;;  %v1864_v51 = vld [vmem:[%s2108_s30 + $0x1d4] sm:$0xf0]  ;;  %v1831_v54 = vld [vmem:[%s2108_s30 + $0xd4] sm:$0xf] }
  0xf8   : > { %v1589_v55 = vld [vmem:[%s2108_s30 + $0xd8] sm:$0xf0] }
  0xf9   : > { %v1246_v58 = vmax.f32 %v1182_v56, 0.0  ;;  %v1151_v60 = vadd.f32 %v2244_v0, %v1083_v57  ;;  %v839_v61 = vpop.f32.mrf.mxu2  ;;  %v1863_v56 = vld [vmem:[%s2108_s30 + $0x1d4] sm:$0xf]  ;;  %v1717_v57 = vld [vmem:[%s2108_s30 + $0x1d8] sm:$0xf0] }
  0xfa   : > { %v1008_v62 = vpop.f32.mrf.mxu3 }
  0xfb   : > { %v1310_v63 = vpack.c.bf16 %v1246_v58, %v1246_v58  ;;  %v1215_v1 = vmax.f32 %v1151_v60, 0.0  ;;  %v1009_v2 = vadd.f32 %v1008_v62, %v839_v61  ;;  %v761_v3 = vpop.f32.mrf.mxu0 }
  0xfc   : > { %v930_v4 = vpop.f32.mrf.mxu1 }
  0xfd   : > { %1375 = vst.msk [vmem:[%s2251_s5 + $0x94] sm:$0xf] %vm1337_vm0, %v1310_v63  ;;  %v1279_v5 = vpack.c.bf16 %v1215_v1, %v1215_v1  ;;  %v1115_v6 = vmul.f32 %v2239_v59, %v1009_v2  ;;  %v931_v7 = vadd.f32 %v930_v4, %v761_v3  ;;  %v1588_v63 = vor.u32 %v1832_v49, %v1587_v48 }
  0xfe   : > { %v1716_v1 = vor.u32 %v1864_v51, %v1715_v50  ;;  %v1592_v2 = vor.u32 %v1831_v54, %v1589_v55 }
  0xff   : > { %1344 = vst.msk [vmem:[%s2251_s5 + $0x18] sm:$0xf] %vm1337_vm0, %v1279_v5  ;;  %v1183_v12 = vadd.f32 %v2244_v0, %v1115_v6  ;;  %v1084_v13 = vmul.f32 %v2239_v59, %v931_v7  ;;  %v1720_v7 = vor.u32 %v1863_v56, %v1717_v57 }
 0x101   : > { %v1247_v18 = vmax.f32 %v1183_v12, 0.0  ;;  %v1152_v19 = vadd.f32 %v2244_v0, %v1084_v13  ;;  %v841_v20 = vpop.f32.mrf.mxu2 }
 0x102   : > { %v1010_v21 = vpop.f32.mrf.mxu3 }
 0x103   : > { %v1311_v25 = vpack.c.bf16 %v1247_v18, %v1247_v18  ;;  %v1216_v26 = vmax.f32 %v1152_v19, 0.0  ;;  %v1011_v27 = vadd.f32 %v1010_v21, %v841_v20  ;;  %v764_v28 = vpop.f32.mrf.mxu0 }
 0x104   : > { %v933_v30 = vpop.f32.mrf.mxu1 }
 0x105   : > { %1376 = vst.msk [vmem:[%s2251_s5 + $0x98] sm:$0xf] %vm1337_vm0, %v1311_v25  ;;  %v1280_v31 = vpack.c.bf16 %v1216_v26, %v1216_v26  ;;  %v1116_v32 = vmul.f32 %v2239_v59, %v1011_v27  ;;  %v934_v33 = vadd.f32 %v933_v30, %v764_v28  ;;  %v1595_v26 = vld [vmem:[%s2108_s30 + $0xe0] sm:$0xf]  ;;  %v1834_v27 = vld [vmem:[%s2108_s30 + $0xe4] sm:$0xf0] }
 0x106   : > { %803 = vmatmul.bf16.gmra.mxu0 %v1580_v22  ;;  %883 = vmatmul.bf16.gmra.mxu2 %v1708_v23  ;;  %v1723_v28 = vld [vmem:[%s2108_s30 + $0x1e0] sm:$0xf] }
 0x107   : > { %1345 = vst.msk [vmem:[%s2251_s5 + $0x1c] sm:$0xf] %vm1337_vm0, %v1280_v31  ;;  %v1184_v34 = vadd.f32 %v2244_v0, %v1116_v32  ;;  %v1085_v35 = vmul.f32 %v2239_v59, %v934_v33  ;;  %972 = vmatmul.bf16.gmra.mxu1 %v1584_v24  ;;  %1052 = vmatmul.bf16.gmra.mxu3 %v1712_v29  ;;  %v1866_v29 = vld [vmem:[%s2108_s30 + $0x1e4] sm:$0xf0]  ;;  %v1833_v32 = vld [vmem:[%s2108_s30 + $0xe4] sm:$0xf] }
 0x108   : > { %v1597_v33 = vld [vmem:[%s2108_s30 + $0xe8] sm:$0xf0] }
 0x109   : > { %v1248_v36 = vmax.f32 %v1184_v34, 0.0  ;;  %v1153_v37 = vadd.f32 %v2244_v0, %v1085_v35  ;;  %v844_v38 = vpop.f32.mrf.mxu2  ;;  %v1865_v34 = vld [vmem:[%s2108_s30 + $0x1e4] sm:$0xf]  ;;  %v1725_v35 = vld [vmem:[%s2108_s30 + $0x1e8] sm:$0xf0] }
 0x10a   : > { %v1013_v39 = vpop.f32.mrf.mxu3 }
 0x10b   : > { %v1312_v40 = vpack.c.bf16 %v1248_v36, %v1248_v36  ;;  %v1217_v41 = vmax.f32 %v1153_v37, 0.0  ;;  %v1014_v42 = vadd.f32 %v1013_v39, %v844_v38  ;;  %v766_v43 = vpop.f32.mrf.mxu0 }
 0x10c   : > { %v935_v44 = vpop.f32.mrf.mxu1 }
 0x10d   : > { %1377 = vst.msk [vmem:[%s2251_s5 + $0x9c] sm:$0xf] %vm1337_vm0, %v1312_v40  ;;  %v1281_v45 = vpack.c.bf16 %v1217_v41, %v1217_v41  ;;  %v1117_v46 = vmul.f32 %v2239_v59, %v1014_v42  ;;  %v936_v47 = vadd.f32 %v935_v44, %v766_v43  ;;  %v1596_v40 = vor.u32 %v1834_v27, %v1595_v26 }
 0x10e   : > { %v1724_v41 = vor.u32 %v1866_v29, %v1723_v28  ;;  %v1600_v42 = vor.u32 %v1833_v32, %v1597_v33 }
 0x10f   : > { %1346 = vst.msk [vmem:[%s2251_s5 + $0x20] sm:$0xf] %vm1337_vm0, %v1281_v45  ;;  %v1185_v52 = vadd.f32 %v2244_v0, %v1117_v46  ;;  %v1086_v53 = vmul.f32 %v2239_v59, %v936_v47  ;;  %v1728_v47 = vor.u32 %v1865_v34, %v1725_v35 }
 0x111   : > { %v1249_v58 = vmax.f32 %v1185_v52, 0.0  ;;  %v1154_v60 = vadd.f32 %v2244_v0, %v1086_v53  ;;  %v846_v61 = vpop.f32.mrf.mxu2 }
 0x112   : > { %v1015_v62 = vpop.f32.mrf.mxu3 }
 0x113   : > { %v1313_v3 = vpack.c.bf16 %v1249_v58, %v1249_v58  ;;  %v1218_v4 = vmax.f32 %v1154_v60, 0.0  ;;  %v1016_v5 = vadd.f32 %v1015_v62, %v846_v61  ;;  %v769_v6 = vpop.f32.mrf.mxu0 }
 0x114   : > { %v938_v8 = vpop.f32.mrf.mxu1 }
 0x115   : > { %1378 = vst.msk [vmem:[%s2251_s5 + $0xa0] sm:$0xf] %vm1337_vm0, %v1313_v3  ;;  %v1282_v9 = vpack.c.bf16 %v1218_v4, %v1218_v4  ;;  %v1118_v10 = vmul.f32 %v2239_v59, %v1016_v5  ;;  %v939_v11 = vadd.f32 %v938_v8, %v769_v6  ;;  %v1603_v4 = vld [vmem:[%s2108_s30 + $0xf0] sm:$0xf]  ;;  %v1836_v5 = vld [vmem:[%s2108_s30 + $0xf4] sm:$0xf0] }
 0x116   : > { %808 = vmatmul.bf16.gmra.mxu0 %v1588_v63  ;;  %888 = vmatmul.bf16.gmra.mxu2 %v1716_v1  ;;  %v1731_v6 = vld [vmem:[%s2108_s30 + $0x1f0] sm:$0xf] }
 0x117   : > { %1347 = vst.msk [vmem:[%s2251_s5 + $0x24] sm:$0xf] %vm1337_vm0, %v1282_v9  ;;  %v1186_v12 = vadd.f32 %v2244_v0, %v1118_v10  ;;  %v1087_v13 = vmul.f32 %v2239_v59, %v939_v11  ;;  %977 = vmatmul.bf16.gmra.mxu1 %v1592_v2  ;;  %1057 = vmatmul.bf16.gmra.mxu3 %v1720_v7  ;;  %v1868_v7 = vld [vmem:[%s2108_s30 + $0x1f4] sm:$0xf0]  ;;  %v1835_v10 = vld [vmem:[%s2108_s30 + $0xf4] sm:$0xf] }
 0x118   : > { %v1605_v11 = vld [vmem:[%s2108_s30 + $0xf8] sm:$0xf0] }
 0x119   : > { %v1250_v14 = vmax.f32 %v1186_v12, 0.0  ;;  %v1155_v15 = vadd.f32 %v2244_v0, %v1087_v13  ;;  %v849_v16 = vpop.f32.mrf.mxu2  ;;  %v1867_v12 = vld [vmem:[%s2108_s30 + $0x1f4] sm:$0xf]  ;;  %v1733_v13 = vld [vmem:[%s2108_s30 + $0x1f8] sm:$0xf0] }
 0x11a   : > { %v1018_v17 = vpop.f32.mrf.mxu3 }
 0x11b   : > { %v1314_v18 = vpack.c.bf16 %v1250_v14, %v1250_v14  ;;  %v1219_v19 = vmax.f32 %v1155_v15, 0.0  ;;  %v1019_v20 = vadd.f32 %v1018_v17, %v849_v16  ;;  %v771_v21 = vpop.f32.mrf.mxu0 }
 0x11c   : > { %v940_v22 = vpop.f32.mrf.mxu1 }
 0x11d   : > { %1379 = vst.msk [vmem:[%s2251_s5 + $0xa4] sm:$0xf] %vm1337_vm0, %v1314_v18  ;;  %v1283_v23 = vpack.c.bf16 %v1219_v19, %v1219_v19  ;;  %v1119_v24 = vmul.f32 %v2239_v59, %v1019_v20  ;;  %v941_v25 = vadd.f32 %v940_v22, %v771_v21  ;;  %v1604_v18 = vor.u32 %v1836_v5, %v1603_v4 }
 0x11e   : > { %v1732_v19 = vor.u32 %v1868_v7, %v1731_v6  ;;  %v1608_v20 = vor.u32 %v1835_v10, %v1605_v11 }
 0x11f   : > { %1348 = vst.msk [vmem:[%s2251_s5 + $0x28] sm:$0xf] %vm1337_vm0, %v1283_v23  ;;  %v1187_v30 = vadd.f32 %v2244_v0, %v1119_v24  ;;  %v1088_v31 = vmul.f32 %v2239_v59, %v941_v25  ;;  %v1736_v25 = vor.u32 %v1867_v12, %v1733_v13 }
 0x121   : > { %v1251_v36 = vmax.f32 %v1187_v30, 0.0  ;;  %v1156_v37 = vadd.f32 %v2244_v0, %v1088_v31  ;;  %v851_v38 = vpop.f32.mrf.mxu2 }
 0x122   : > { %v1020_v39 = vpop.f32.mrf.mxu3 }
 0x123   : > { %v1315_v43 = vpack.c.bf16 %v1251_v36, %v1251_v36  ;;  %v1220_v44 = vmax.f32 %v1156_v37, 0.0  ;;  %v1021_v45 = vadd.f32 %v1020_v39, %v851_v38  ;;  %v774_v46 = vpop.f32.mrf.mxu0 }
 0x124   : > { %v943_v48 = vpop.f32.mrf.mxu1 }
 0x125   : > { %1380 = vst.msk [vmem:[%s2251_s5 + $0xa8] sm:$0xf] %vm1337_vm0, %v1315_v43  ;;  %v1284_v49 = vpack.c.bf16 %v1220_v44, %v1220_v44  ;;  %v1120_v50 = vmul.f32 %v2239_v59, %v1021_v45  ;;  %v944_v51 = vadd.f32 %v943_v48, %v774_v46 }
 0x126   : > { %813 = vmatmul.bf16.gmra.mxu0 %v1596_v40  ;;  %893 = vmatmul.bf16.gmra.mxu2 %v1724_v41 }
 0x127   : > { %1349 = vst.msk [vmem:[%s2251_s5 + $0x2c] sm:$0xf] %vm1337_vm0, %v1284_v49  ;;  %v1188_v52 = vadd.f32 %v2244_v0, %v1120_v50  ;;  %v1089_v53 = vmul.f32 %v2239_v59, %v944_v51  ;;  %982 = vmatmul.bf16.gmra.mxu1 %v1600_v42  ;;  %1062 = vmatmul.bf16.gmra.mxu3 %v1728_v47 }
 0x129   : > { %v1252_v54 = vmax.f32 %v1188_v52, 0.0  ;;  %v1157_v55 = vadd.f32 %v2244_v0, %v1089_v53  ;;  %v854_v56 = vpop.f32.mrf.mxu2 }
 0x12a   : > { %v1023_v57 = vpop.f32.mrf.mxu3 }
 0x12b   : > { %v1316_v58 = vpack.c.bf16 %v1252_v54, %v1252_v54  ;;  %v1221_v60 = vmax.f32 %v1157_v55, 0.0  ;;  %v1024_v61 = vadd.f32 %v1023_v57, %v854_v56  ;;  %v776_v62 = vpop.f32.mrf.mxu0 }
 0x12c   : > { %v945_v63 = vpop.f32.mrf.mxu1 }
 0x12d   : > { %1381 = vst.msk [vmem:[%s2251_s5 + $0xac] sm:$0xf] %vm1337_vm0, %v1316_v58  ;;  %v1285_v1 = vpack.c.bf16 %v1221_v60, %v1221_v60  ;;  %v1121_v2 = vmul.f32 %v2239_v59, %v1024_v61  ;;  %v946_v3 = vadd.f32 %v945_v63, %v776_v62 }
 0x12f   : > { %1350 = vst.msk [vmem:[%s2251_s5 + $0x30] sm:$0xf] %vm1337_vm0, %v1285_v1  ;;  %v1189_v8 = vadd.f32 %v2244_v0, %v1121_v2  ;;  %v1090_v9 = vmul.f32 %v2239_v59, %v946_v3 }
 0x131   : > { %v1253_v14 = vmax.f32 %v1189_v8, 0.0  ;;  %v1158_v15 = vadd.f32 %v2244_v0, %v1090_v9  ;;  %v856_v16 = vpop.f32.mrf.mxu2 }
 0x132   : > { %v1025_v17 = vpop.f32.mrf.mxu3 }
 0x133   : > { %v1317_v21 = vpack.c.bf16 %v1253_v14, %v1253_v14  ;;  %v1222_v22 = vmax.f32 %v1158_v15, 0.0  ;;  %v1026_v23 = vadd.f32 %v1025_v17, %v856_v16  ;;  %v779_v24 = vpop.f32.mrf.mxu0 }
 0x134   : > { %v948_v26 = vpop.f32.mrf.mxu1 }
 0x135   : > { %1382 = vst.msk [vmem:[%s2251_s5 + $0xb0] sm:$0xf] %vm1337_vm0, %v1317_v21  ;;  %v1286_v27 = vpack.c.bf16 %v1222_v22, %v1222_v22  ;;  %v1122_v28 = vmul.f32 %v2239_v59, %v1026_v23  ;;  %v949_v29 = vadd.f32 %v948_v26, %v779_v24 }
 0x136   : > { %818 = vmatmul.bf16.gmra.mxu0 %v1604_v18  ;;  %898 = vmatmul.bf16.gmra.mxu2 %v1732_v19 }
 0x137   : > { %1351 = vst.msk [vmem:[%s2251_s5 + $0x34] sm:$0xf] %vm1337_vm0, %v1286_v27  ;;  %v1190_v30 = vadd.f32 %v2244_v0, %v1122_v28  ;;  %v1091_v31 = vmul.f32 %v2239_v59, %v949_v29  ;;  %987 = vmatmul.bf16.gmra.mxu1 %v1608_v20  ;;  %1067 = vmatmul.bf16.gmra.mxu3 %v1736_v25 }
 0x139   : > { %v1254_v32 = vmax.f32 %v1190_v30, 0.0  ;;  %v1159_v33 = vadd.f32 %v2244_v0, %v1091_v31  ;;  %v859_v34 = vpop.f32.mrf.mxu2 }
 0x13a   : > { %v1028_v35 = vpop.f32.mrf.mxu3 }
 0x13b   : > { %v1318_v36 = vpack.c.bf16 %v1254_v32, %v1254_v32  ;;  %v1223_v37 = vmax.f32 %v1159_v33, 0.0  ;;  %v1029_v38 = vadd.f32 %v1028_v35, %v859_v34  ;;  %v781_v39 = vpop.f32.mrf.mxu0 }
 0x13c   : > { %v950_v40 = vpop.f32.mrf.mxu1 }
 0x13d   : > { %1383 = vst.msk [vmem:[%s2251_s5 + $0xb4] sm:$0xf] %vm1337_vm0, %v1318_v36  ;;  %v1287_v41 = vpack.c.bf16 %v1223_v37, %v1223_v37  ;;  %v1123_v42 = vmul.f32 %v2239_v59, %v1029_v38  ;;  %v951_v43 = vadd.f32 %v950_v40, %v781_v39 }
 0x13f   : > { %1352 = vst.msk [vmem:[%s2251_s5 + $0x38] sm:$0xf] %vm1337_vm0, %v1287_v41  ;;  %v1191_v44 = vadd.f32 %v2244_v0, %v1123_v42  ;;  %v1092_v45 = vmul.f32 %v2239_v59, %v951_v43 }
 0x141   : > { %v1255_v46 = vmax.f32 %v1191_v44, 0.0  ;;  %v1160_v47 = vadd.f32 %v2244_v0, %v1092_v45  ;;  %v861_v48 = vpop.f32.mrf.mxu2 }
 0x142   : > { %v1030_v49 = vpop.f32.mrf.mxu3 }
 0x143   : > { %v1319_v50 = vpack.c.bf16 %v1255_v46, %v1255_v46  ;;  %v1224_v51 = vmax.f32 %v1160_v47, 0.0  ;;  %v1031_v52 = vadd.f32 %v1030_v49, %v861_v48  ;;  %v784_v53 = vpop.f32.mrf.mxu0 }
 0x144   : > { %v953_v54 = vpop.f32.mrf.mxu1 }
 0x145   : > { %1384 = vst.msk [vmem:[%s2251_s5 + $0xb8] sm:$0xf] %vm1337_vm0, %v1319_v50  ;;  %v1288_v55 = vpack.c.bf16 %v1224_v51, %v1224_v51  ;;  %v1124_v56 = vmul.f32 %v2239_v59, %v1031_v52  ;;  %v954_v57 = vadd.f32 %v953_v54, %v784_v53 }
 0x147   : > { %1353 = vst.msk [vmem:[%s2251_s5 + $0x3c] sm:$0xf] %vm1337_vm0, %v1288_v55  ;;  %v1192_v58 = vadd.f32 %v2244_v0, %v1124_v56  ;;  %v1093_v60 = vmul.f32 %v2239_v59, %v954_v57 }
 0x149   : > { %v1256_v61 = vmax.f32 %v1192_v58, 0.0  ;;  %v1161_v62 = vadd.f32 %v2244_v0, %v1093_v60  ;;  %v864_v63 = vpop.f32.mrf.mxu2 }
 0x14a   : > { %v1033_v1 = vpop.f32.mrf.mxu3 }
 0x14b   : > { %v1320_v2 = vpack.c.bf16 %v1256_v61, %v1256_v61  ;;  %v1225_v3 = vmax.f32 %v1161_v62, 0.0  ;;  %v1034_v4 = vadd.f32 %v1033_v1, %v864_v63  ;;  %v786_v5 = vpop.f32.mrf.mxu0 }
 0x14c   : > { %v955_v6 = vpop.f32.mrf.mxu1 }
 0x14d   : > { %1385 = vst.msk [vmem:[%s2251_s5 + $0xbc] sm:$0xf] %vm1337_vm0, %v1320_v2  ;;  %v1289_v7 = vpack.c.bf16 %v1225_v3, %v1225_v3  ;;  %v1125_v8 = vmul.f32 %v2239_v59, %v1034_v4  ;;  %v956_v9 = vadd.f32 %v955_v6, %v786_v5 }
 0x14f   : > { %1354 = vst.msk [vmem:[%s2251_s5 + $0x40] sm:$0xf] %vm1337_vm0, %v1289_v7  ;;  %v1193_v10 = vadd.f32 %v2244_v0, %v1125_v8  ;;  %v1094_v11 = vmul.f32 %v2239_v59, %v956_v9 }
 0x151   : > { %v1257_v12 = vmax.f32 %v1193_v10, 0.0  ;;  %v1162_v13 = vadd.f32 %v2244_v0, %v1094_v11  ;;  %v866_v14 = vpop.f32.mrf.mxu2 }
 0x152   : > { %v1035_v15 = vpop.f32.mrf.mxu3 }
 0x153   : > { %v1321_v16 = vpack.c.bf16 %v1257_v12, %v1257_v12  ;;  %v1226_v17 = vmax.f32 %v1162_v13, 0.0  ;;  %v1036_v18 = vadd.f32 %v1035_v15, %v866_v14  ;;  %v789_v19 = vpop.f32.mrf.mxu0 }
 0x154   : > { %v958_v20 = vpop.f32.mrf.mxu1 }
 0x155   : > { %1386 = vst.msk [vmem:[%s2251_s5 + $0xc0] sm:$0xf] %vm1337_vm0, %v1321_v16  ;;  %v1290_v21 = vpack.c.bf16 %v1226_v17, %v1226_v17  ;;  %v1126_v22 = vmul.f32 %v2239_v59, %v1036_v18  ;;  %v959_v23 = vadd.f32 %v958_v20, %v789_v19 }
 0x157   : > { %1355 = vst.msk [vmem:[%s2251_s5 + $0x44] sm:$0xf] %vm1337_vm0, %v1290_v21  ;;  %v1194_v24 = vadd.f32 %v2244_v0, %v1126_v22  ;;  %v1095_v25 = vmul.f32 %v2239_v59, %v959_v23 }
 0x159   : > { %v1258_v26 = vmax.f32 %v1194_v24, 0.0  ;;  %v1163_v27 = vadd.f32 %v2244_v0, %v1095_v25  ;;  %v869_v28 = vpop.f32.mrf.mxu2 }
 0x15a   : > { %v1038_v29 = vpop.f32.mrf.mxu3 }
 0x15b   : > { %v1322_v30 = vpack.c.bf16 %v1258_v26, %v1258_v26  ;;  %v1227_v31 = vmax.f32 %v1163_v27, 0.0  ;;  %v1039_v32 = vadd.f32 %v1038_v29, %v869_v28  ;;  %v791_v33 = vpop.f32.mrf.mxu0 }
 0x15c   : > { %v960_v34 = vpop.f32.mrf.mxu1 }
 0x15d   : > { %1387 = vst.msk [vmem:[%s2251_s5 + $0xc4] sm:$0xf] %vm1337_vm0, %v1322_v30  ;;  %v1291_v35 = vpack.c.bf16 %v1227_v31, %v1227_v31  ;;  %v1127_v36 = vmul.f32 %v2239_v59, %v1039_v32  ;;  %v961_v37 = vadd.f32 %v960_v34, %v791_v33 }
 0x15f   : > { %1356 = vst.msk [vmem:[%s2251_s5 + $0x48] sm:$0xf] %vm1337_vm0, %v1291_v35  ;;  %v1195_v38 = vadd.f32 %v2244_v0, %v1127_v36  ;;  %v1096_v39 = vmul.f32 %v2239_v59, %v961_v37 }
 0x161   : > { %v1259_v40 = vmax.f32 %v1195_v38, 0.0  ;;  %v1164_v41 = vadd.f32 %v2244_v0, %v1096_v39  ;;  %v871_v42 = vpop.f32.mrf.mxu2 }
 0x162   : > { %v1040_v43 = vpop.f32.mrf.mxu3 }
 0x163   : > { %v1323_v44 = vpack.c.bf16 %v1259_v40, %v1259_v40  ;;  %v1228_v45 = vmax.f32 %v1164_v41, 0.0  ;;  %v1041_v46 = vadd.f32 %v1040_v43, %v871_v42  ;;  %v794_v47 = vpop.f32.mrf.mxu0 }
 0x164   : > { %v963_v48 = vpop.f32.mrf.mxu1 }
 0x165   : > { %1388 = vst.msk [vmem:[%s2251_s5 + $0xc8] sm:$0xf] %vm1337_vm0, %v1323_v44  ;;  %v1292_v49 = vpack.c.bf16 %v1228_v45, %v1228_v45  ;;  %v1128_v50 = vmul.f32 %v2239_v59, %v1041_v46  ;;  %v964_v51 = vadd.f32 %v963_v48, %v794_v47 }
 0x167   : > { %1357 = vst.msk [vmem:[%s2251_s5 + $0x4c] sm:$0xf] %vm1337_vm0, %v1292_v49  ;;  %v1196_v52 = vadd.f32 %v2244_v0, %v1128_v50  ;;  %v1097_v53 = vmul.f32 %v2239_v59, %v964_v51 }
 0x169   : > { %v1260_v54 = vmax.f32 %v1196_v52, 0.0  ;;  %v1165_v55 = vadd.f32 %v2244_v0, %v1097_v53  ;;  %v874_v56 = vpop.f32.mrf.mxu2 }
 0x16a   : > { %v1043_v57 = vpop.f32.mrf.mxu3 }
 0x16b   : > { %v1324_v58 = vpack.c.bf16 %v1260_v54, %v1260_v54  ;;  %v1229_v60 = vmax.f32 %v1165_v55, 0.0  ;;  %v1044_v61 = vadd.f32 %v1043_v57, %v874_v56  ;;  %v796_v62 = vpop.f32.mrf.mxu0 }
 0x16c   : > { %v965_v63 = vpop.f32.mrf.mxu1 }
 0x16d   : > { %1389 = vst.msk [vmem:[%s2251_s5 + $0xcc] sm:$0xf] %vm1337_vm0, %v1324_v58  ;;  %v1293_v1 = vpack.c.bf16 %v1229_v60, %v1229_v60  ;;  %v1129_v2 = vmul.f32 %v2239_v59, %v1044_v61  ;;  %v966_v3 = vadd.f32 %v965_v63, %v796_v62  ;;  %v2504_v58 = vld [vmem:[%s2588_s2] ss:$0 sm:$0xff] }
 0x16f   : > { %1358 = vst.msk [vmem:[%s2251_s5 + $0x50] sm:$0xf] %vm1337_vm0, %v1293_v1  ;;  %v1197_v4 = vadd.f32 %v2244_v0, %v1129_v2  ;;  %v1098_v5 = vmul.f32 %v2239_v59, %v966_v3 }
 0x171   : > { %v1261_v6 = vmax.f32 %v1197_v4, 0.0  ;;  %v1166_v7 = vadd.f32 %v2244_v0, %v1098_v5  ;;  %v876_v8 = vpop.f32.mrf.mxu2 }
 0x172   : > { %v1045_v9 = vpop.f32.mrf.mxu3 }
 0x173   : > { %v1325_v10 = vpack.c.bf16 %v1261_v6, %v1261_v6  ;;  %v1230_v11 = vmax.f32 %v1166_v7, 0.0  ;;  %v1046_v12 = vadd.f32 %v1045_v9, %v876_v8  ;;  %v799_v13 = vpop.f32.mrf.mxu0 }
 0x174   : > { %v968_v14 = vpop.f32.mrf.mxu1 }
 0x175   : > { %1390 = vst.msk [vmem:[%s2251_s5 + $0xd0] sm:$0xf] %vm1337_vm0, %v1325_v10  ;;  %v1294_v15 = vpack.c.bf16 %v1230_v11, %v1230_v11  ;;  %v1130_v16 = vmul.f32 %v2239_v59, %v1046_v12  ;;  %v969_v17 = vadd.f32 %v968_v14, %v799_v13 }
 0x177   : > { %1359 = vst.msk [vmem:[%s2251_s5 + $0x54] sm:$0xf] %vm1337_vm0, %v1294_v15  ;;  %v1198_v18 = vadd.f32 %v2244_v0, %v1130_v16  ;;  %v1099_v19 = vmul.f32 %v2239_v59, %v969_v17 }
 0x179   : > { %v1262_v20 = vmax.f32 %v1198_v18, 0.0  ;;  %v1167_v21 = vadd.f32 %v2244_v0, %v1099_v19  ;;  %v879_v22 = vpop.f32.mrf.mxu2 }
 0x17a   : > { %v1048_v23 = vpop.f32.mrf.mxu3 }
 0x17b   : > { %v1326_v24 = vpack.c.bf16 %v1262_v20, %v1262_v20  ;;  %v1231_v25 = vmax.f32 %v1167_v21, 0.0  ;;  %v1049_v26 = vadd.f32 %v1048_v23, %v879_v22  ;;  %v801_v27 = vpop.f32.mrf.mxu0 }
 0x17c   : > { %v970_v28 = vpop.f32.mrf.mxu1 }
 0x17d   : > { %1391 = vst.msk [vmem:[%s2251_s5 + $0xd4] sm:$0xf] %vm1337_vm0, %v1326_v24  ;;  %v1295_v29 = vpack.c.bf16 %v1231_v25, %v1231_v25  ;;  %v1131_v30 = vmul.f32 %v2239_v59, %v1049_v26  ;;  %v971_v31 = vadd.f32 %v970_v28, %v801_v27 }
 0x17f   : > { %1360 = vst.msk [vmem:[%s2251_s5 + $0x58] sm:$0xf] %vm1337_vm0, %v1295_v29  ;;  %v1199_v32 = vadd.f32 %v2244_v0, %v1131_v30  ;;  %v1100_v33 = vmul.f32 %v2239_v59, %v971_v31 }
 0x181   : > { %v1263_v34 = vmax.f32 %v1199_v32, 0.0  ;;  %v1168_v35 = vadd.f32 %v2244_v0, %v1100_v33  ;;  %v881_v36 = vpop.f32.mrf.mxu2 }
 0x182   : > { %v1050_v37 = vpop.f32.mrf.mxu3 }
 0x183   : > { %v1327_v38 = vpack.c.bf16 %v1263_v34, %v1263_v34  ;;  %v1232_v39 = vmax.f32 %v1168_v35, 0.0  ;;  %v1051_v40 = vadd.f32 %v1050_v37, %v881_v36  ;;  %v804_v41 = vpop.f32.mrf.mxu0 }
 0x184   : > { %v973_v42 = vpop.f32.mrf.mxu1 }
 0x185   : > { %1392 = vst.msk [vmem:[%s2251_s5 + $0xd8] sm:$0xf] %vm1337_vm0, %v1327_v38  ;;  %v1296_v43 = vpack.c.bf16 %v1232_v39, %v1232_v39  ;;  %v1132_v44 = vmul.f32 %v2239_v59, %v1051_v40  ;;  %v974_v45 = vadd.f32 %v973_v42, %v804_v41 }
 0x187   : > { %1361 = vst.msk [vmem:[%s2251_s5 + $0x5c] sm:$0xf] %vm1337_vm0, %v1296_v43  ;;  %v1200_v46 = vadd.f32 %v2244_v0, %v1132_v44  ;;  %v1101_v47 = vmul.f32 %v2239_v59, %v974_v45 }
 0x189   : > { %v1264_v48 = vmax.f32 %v1200_v46, 0.0  ;;  %v1169_v49 = vadd.f32 %v2244_v0, %v1101_v47  ;;  %v884_v50 = vpop.f32.mrf.mxu2  ;;  %v2512_v0 = vld [vmem:[%s2589_s3] ss:$0 sm:$0xff] }
 0x18a   : > { %v1053_v51 = vpop.f32.mrf.mxu3 }
 0x18b   : > { %v1328_v52 = vpack.c.bf16 %v1264_v48, %v1264_v48  ;;  %v1233_v53 = vmax.f32 %v1169_v49, 0.0  ;;  %v1054_v54 = vadd.f32 %v1053_v51, %v884_v50  ;;  %v806_v55 = vpop.f32.mrf.mxu0 }
 0x18c   : > { %v975_v56 = vpop.f32.mrf.mxu1 }
 0x18d   : > { %1393 = vst.msk [vmem:[%s2251_s5 + $0xdc] sm:$0xf] %vm1337_vm0, %v1328_v52  ;;  %v1297_v57 = vpack.c.bf16 %v1233_v53, %v1233_v53  ;;  %v1133_v59 = vmul.f32 %v2504_v58, %v1054_v54  ;;  %v976_v60 = vadd.f32 %v975_v56, %v806_v55 }
 0x18f   : > { %1362 = vst.msk [vmem:[%s2251_s5 + $0x60] sm:$0xf] %vm1337_vm0, %v1297_v57  ;;  %v1201_v61 = vadd.f32 %v2512_v0, %v1133_v59  ;;  %v1102_v62 = vmul.f32 %v2504_v58, %v976_v60 }
 0x191   : > { %v1265_v63 = vmax.f32 %v1201_v61, 0.0  ;;  %v1170_v1 = vadd.f32 %v2512_v0, %v1102_v62  ;;  %v886_v2 = vpop.f32.mrf.mxu2 }
 0x192   : > { %v1055_v3 = vpop.f32.mrf.mxu3 }
 0x193   : > { %v1329_v4 = vpack.c.bf16 %v1265_v63, %v1265_v63  ;;  %v1234_v5 = vmax.f32 %v1170_v1, 0.0  ;;  %v1056_v6 = vadd.f32 %v1055_v3, %v886_v2  ;;  %v809_v7 = vpop.f32.mrf.mxu0 }
 0x194   : > { %v978_v8 = vpop.f32.mrf.mxu1 }
 0x195   : > { %1394 = vst.msk [vmem:[%s2251_s5 + $0xe0] sm:$0xf] %vm1337_vm0, %v1329_v4  ;;  %v1298_v9 = vpack.c.bf16 %v1234_v5, %v1234_v5  ;;  %v1134_v10 = vmul.f32 %v2504_v58, %v1056_v6  ;;  %v979_v11 = vadd.f32 %v978_v8, %v809_v7 }
 0x197   : > { %1363 = vst.msk [vmem:[%s2251_s5 + $0x64] sm:$0xf] %vm1337_vm0, %v1298_v9  ;;  %v1202_v12 = vadd.f32 %v2512_v0, %v1134_v10  ;;  %v1103_v13 = vmul.f32 %v2504_v58, %v979_v11 }
 0x199   : > { %v1266_v14 = vmax.f32 %v1202_v12, 0.0  ;;  %v1171_v15 = vadd.f32 %v2512_v0, %v1103_v13  ;;  %v889_v16 = vpop.f32.mrf.mxu2 }
 0x19a   : > { %v1058_v17 = vpop.f32.mrf.mxu3 }
 0x19b   : > { %v1330_v18 = vpack.c.bf16 %v1266_v14, %v1266_v14  ;;  %v1235_v19 = vmax.f32 %v1171_v15, 0.0  ;;  %v1059_v20 = vadd.f32 %v1058_v17, %v889_v16  ;;  %v811_v21 = vpop.f32.mrf.mxu0 }
 0x19c   : > { %v980_v22 = vpop.f32.mrf.mxu1 }
 0x19d   : > { %1395 = vst.msk [vmem:[%s2251_s5 + $0xe4] sm:$0xf] %vm1337_vm0, %v1330_v18  ;;  %v1299_v23 = vpack.c.bf16 %v1235_v19, %v1235_v19  ;;  %v1135_v24 = vmul.f32 %v2504_v58, %v1059_v20  ;;  %v981_v25 = vadd.f32 %v980_v22, %v811_v21 }
 0x19f   : > { %1364 = vst.msk [vmem:[%s2251_s5 + $0x68] sm:$0xf] %vm1337_vm0, %v1299_v23  ;;  %v1203_v26 = vadd.f32 %v2512_v0, %v1135_v24  ;;  %v1104_v27 = vmul.f32 %v2504_v58, %v981_v25 }
 0x1a1   : > { %v1267_v28 = vmax.f32 %v1203_v26, 0.0  ;;  %v1172_v29 = vadd.f32 %v2512_v0, %v1104_v27  ;;  %v891_v30 = vpop.f32.mrf.mxu2 }
 0x1a2   : > { %v1060_v31 = vpop.f32.mrf.mxu3 }
 0x1a3   : > { %v1331_v32 = vpack.c.bf16 %v1267_v28, %v1267_v28  ;;  %v1236_v33 = vmax.f32 %v1172_v29, 0.0  ;;  %v1061_v34 = vadd.f32 %v1060_v31, %v891_v30  ;;  %v814_v35 = vpop.f32.mrf.mxu0 }
 0x1a4   : > { %v983_v36 = vpop.f32.mrf.mxu1 }
 0x1a5   : > { %1396 = vst.msk [vmem:[%s2251_s5 + $0xe8] sm:$0xf] %vm1337_vm0, %v1331_v32  ;;  %v1300_v37 = vpack.c.bf16 %v1236_v33, %v1236_v33  ;;  %v1136_v38 = vmul.f32 %v2504_v58, %v1061_v34  ;;  %v984_v39 = vadd.f32 %v983_v36, %v814_v35 }
 0x1a7   : > { %1365 = vst.msk [vmem:[%s2251_s5 + $0x6c] sm:$0xf] %vm1337_vm0, %v1300_v37  ;;  %v1204_v40 = vadd.f32 %v2512_v0, %v1136_v38  ;;  %v1105_v41 = vmul.f32 %v2504_v58, %v984_v39 }
 0x1a9   : > { %v1268_v42 = vmax.f32 %v1204_v40, 0.0  ;;  %v1173_v43 = vadd.f32 %v2512_v0, %v1105_v41  ;;  %v894_v44 = vpop.f32.mrf.mxu2 }
 0x1aa   : > { %v1063_v45 = vpop.f32.mrf.mxu3 }
 0x1ab   : > { %v1332_v46 = vpack.c.bf16 %v1268_v42, %v1268_v42  ;;  %v1237_v47 = vmax.f32 %v1173_v43, 0.0  ;;  %v1064_v48 = vadd.f32 %v1063_v45, %v894_v44  ;;  %v816_v49 = vpop.f32.mrf.mxu0 }
 0x1ac   : > { %v985_v50 = vpop.f32.mrf.mxu1 }
 0x1ad   : > { %1397 = vst.msk [vmem:[%s2251_s5 + $0xec] sm:$0xf] %vm1337_vm0, %v1332_v46  ;;  %v1301_v51 = vpack.c.bf16 %v1237_v47, %v1237_v47  ;;  %v1137_v52 = vmul.f32 %v2504_v58, %v1064_v48  ;;  %v986_v53 = vadd.f32 %v985_v50, %v816_v49 }
 0x1af   : > { %1366 = vst.msk [vmem:[%s2251_s5 + $0x70] sm:$0xf] %vm1337_vm0, %v1301_v51  ;;  %v1205_v54 = vadd.f32 %v2512_v0, %v1137_v52  ;;  %v1106_v55 = vmul.f32 %v2504_v58, %v986_v53 }
 0x1b1   : > { %v1269_v56 = vmax.f32 %v1205_v54, 0.0  ;;  %v1174_v57 = vadd.f32 %v2512_v0, %v1106_v55  ;;  %v896_v59 = vpop.f32.mrf.mxu2 }
 0x1b2   : > { %v1065_v60 = vpop.f32.mrf.mxu3 }
 0x1b3   : > { %v1333_v61 = vpack.c.bf16 %v1269_v56, %v1269_v56  ;;  %v1238_v62 = vmax.f32 %v1174_v57, 0.0  ;;  %v1066_v63 = vadd.f32 %v1065_v60, %v896_v59  ;;  %v819_v1 = vpop.f32.mrf.mxu0 }
 0x1b4   : > { %v988_v2 = vpop.f32.mrf.mxu1 }
 0x1b5   : > { %1398 = vst.msk [vmem:[%s2251_s5 + $0xf0] sm:$0xf] %vm1337_vm0, %v1333_v61  ;;  %v1302_v3 = vpack.c.bf16 %v1238_v62, %v1238_v62  ;;  %v1138_v4 = vmul.f32 %v2504_v58, %v1066_v63  ;;  %v989_v5 = vadd.f32 %v988_v2, %v819_v1 }
 0x1b7   : > { %1367 = vst.msk [vmem:[%s2251_s5 + $0x74] sm:$0xf] %vm1337_vm0, %v1302_v3  ;;  %v1206_v6 = vadd.f32 %v2512_v0, %v1138_v4  ;;  %v1107_v7 = vmul.f32 %v2504_v58, %v989_v5 }
 0x1b9   : > { %v1270_v8 = vmax.f32 %v1206_v6, 0.0  ;;  %v1175_v9 = vadd.f32 %v2512_v0, %v1107_v7  ;;  %v899_v10 = vpop.f32.mrf.mxu2 }
 0x1ba   : > { %v1068_v11 = vpop.f32.mrf.mxu3 }
 0x1bb   : > { %v1334_v12 = vpack.c.bf16 %v1270_v8, %v1270_v8  ;;  %v1239_v13 = vmax.f32 %v1175_v9, 0.0  ;;  %v1069_v14 = vadd.f32 %v1068_v11, %v899_v10  ;;  %v821_v15 = vpop.f32.mrf.mxu0 }
 0x1bc   : > { %v990_v16 = vpop.f32.mrf.mxu1 }
 0x1bd   : > { %1399 = vst.msk [vmem:[%s2251_s5 + $0xf4] sm:$0xf] %vm1337_vm0, %v1334_v12  ;;  %v1303_v17 = vpack.c.bf16 %v1239_v13, %v1239_v13  ;;  %v1139_v18 = vmul.f32 %v2504_v58, %v1069_v14  ;;  %v991_v19 = vadd.f32 %v990_v16, %v821_v15 }
 0x1bf   : > { %1368 = vst.msk [vmem:[%s2251_s5 + $0x78] sm:$0xf] %vm1337_vm0, %v1303_v17  ;;  %v1207_v20 = vadd.f32 %v2512_v0, %v1139_v18  ;;  %v1108_v21 = vmul.f32 %v2504_v58, %v991_v19 }
 0x1c1   : > { %v1271_v22 = vmax.f32 %v1207_v20, 0.0  ;;  %v1176_v23 = vadd.f32 %v2512_v0, %v1108_v21  ;;  %v901_v24 = vpop.f32.mrf.mxu2 }
 0x1c2   : > { %v1070_v25 = vpop.f32.mrf.mxu3 }
 0x1c3   : > { %v1335_v26 = vpack.c.bf16 %v1271_v22, %v1271_v22  ;;  %v1240_v27 = vmax.f32 %v1176_v23, 0.0  ;;  %v1071_v28 = vadd.f32 %v1070_v25, %v901_v24 }
 0x1c5   : > { %1400 = vst.msk [vmem:[%s2251_s5 + $0xf8] sm:$0xf] %vm1337_vm0, %v1335_v26  ;;  %v1304_v29 = vpack.c.bf16 %v1240_v27, %v1240_v27  ;;  %v1140_v30 = vmul.f32 %v2504_v58, %v1071_v28 }
 0x1c7   : > { %1369 = vst.msk [vmem:[%s2251_s5 + $0x7c] sm:$0xf] %vm1337_vm0, %v1304_v29  ;;  %v1208_v31 = vadd.f32 %v2512_v0, %v1140_v30 }
 0x1c9   : > { %v1272_v32 = vmax.f32 %v1208_v31, 0.0 }
 0x1cb   : > { %v1336_v33 = vpack.c.bf16 %v1272_v32, %v1272_v32 }
 0x1cd   : > { %1401 = vst.msk [vmem:[%s2251_s5 + $0xfc] sm:$0xf] %vm1337_vm0, %v1336_v33 }
 0x1ce PF: > { %p14_p7 = scmp.ge.s32.totalorder %s2059_s20, 6   ;;  %s2594_s15 = smov %s2002_s16 }
 0x1cf   : > { %s2595_s16 = smov %s2006_s17  ;;  %s2596_s17 = smov %s2069_s23 }
 0x1d0   : > { %s2597_s18 = smov %s2059_s20  ;;  %16 = sbr.rel (!%p14_p7) target bundleno = 3 (0x3), region = 76 }
 0x1d5   :  { %1424 = vsyncpa [#allocation3], 1 }
 0x1d6   :  { %1426 = vsyncpa [#allocation3 + $0x1], 1 }

</bundles_post_ra>
